<compile_context>
chip_gen: v7x
topology: tpu7x:2x2x1
jax: 0.10.0
libtpu: 0.0.40
codegen_flags: <defaults>
</compile_context>

<pallas_src>
import jax
import jax.numpy as jnp
from jax import lax
from jax.experimental import pallas as pl
from jax.experimental.pallas import tpu as pltpu


# dot_general dimension numbers: contract the trailing dim of both operands.
_CONTRACT_LAST = (((1,), (1,)), ((), ()))


def _mlp_kernel(x_ref, wg_ref, wu_ref, wd_ref, o_ref, acc_ref):
    k = pl.program_id(1)

    @pl.when(k == 0)
    def _init():
        acc_ref[...] = jnp.zeros_like(acc_ref)

    x = x_ref[...]
    # gate/up: [tm, H] x [ti, H] (contract H) -> f32 [tm, ti] on the MXU.
    gate = lax.dot_general(x, wg_ref[...], _CONTRACT_LAST,
                           preferred_element_type=jnp.float32)
    up = lax.dot_general(x, wu_ref[...], _CONTRACT_LAST,
                         preferred_element_type=jnp.float32)

    # SiLU(gate) * up in f32: gate * sigmoid(gate) * up.
    # exp + approximate reciprocal occupy the otherwise-idle EUP slot.
    # Clamp the exponent so exp(-gate) never overflows to inf for gate << 0.
    e = jnp.exp(jnp.minimum(-gate, 60.0))
    sig = pl.reciprocal(1.0 + e, approx=True)
    h = (gate * sig * up).astype(wd_ref.dtype)   # back to weight dtype for full-rate MXU

    # Partial down-proj: [tm, ti] x [H, ti] (contract ti) -> f32 [tm, H],
    # accumulated into the resident f32 output tile.
    acc_ref[...] += lax.dot_general(h, wd_ref[...], _CONTRACT_LAST,
                                    preferred_element_type=jnp.float32)

    @pl.when(k == pl.num_programs(1) - 1)
    def _finalize():
        o_ref[...] = acc_ref[...].astype(o_ref.dtype)


def _round_up(x, m):
    return ((x + m - 1) // m) * m


def _tpu_generation():
    try:
        kind = jax.devices()[0].device_kind.lower()
    except Exception:
        return None
    for tag, gen in (("v7", 7), ("v6", 6), ("v5", 5), ("v4", 4), ("v3", 3)):
        if tag in kind:
            return gen
    return None


def _gen_config(gen):
    """-> (tm_pref, ti_pref, vmem_limit_bytes|None, single_buffer_io, core_parallel)."""
    if gen == 7:    # 2 TC/chip, 64 MiB VMEM, ridge ~310 FLOP/B
        return 512, 512, 56 * 2**20, True, True
    if gen == 6:    # 128 MiB VMEM, ridge ~660 FLOP/B
        return 1024, 1024, 100 * 2**20, False, False
    if gen == 5:    # 128 MiB VMEM, ridge ~240 FLOP/B
        return 384, 1024, 96 * 2**20, False, False
    if gen == 4:
        return 512, 512, 64 * 2**20, False, False
    # v3 / unknown: stay within the default scoped-VMEM limit.
    return 256, 512, None, False, False


def _ti_candidates(intermediate, ti_pref):
    top = min(intermediate, ti_pref)
    cands = [d for d in range(128, top + 1, 128) if intermediate % d == 0]
    if not cands:
        return [intermediate]
    return sorted(cands, reverse=True)


def _vmem_need(tm, ti, hidden, x_bytes, w_bytes, out_bytes, io_bufs):
    return (io_bufs * tm * hidden * x_bytes        # x tile(s)
            + 2 * 2 * ti * hidden * w_bytes        # gate + up weight tiles (double-buffered)
            + 2 * hidden * ti * w_bytes            # down weight tile (double-buffered)
            + io_bufs * tm * hidden * out_bytes    # output tile(s)
            + tm * hidden * 4                      # f32 accumulator scratch
            + 3 * tm * ti * 4)                     # gate/up/h f32 temporaries


def eff_act_mlp(x, gate_w, up_w, down_w, *, tm=None, ti=None):
    """Fused gated-MLP forward (LLaMA MLP, mlp_bias=False).

    x:       [..., hidden]
    gate_w:  [intermediate, hidden]   (PyTorch nn.Linear layout: (out, in))
    up_w:    [intermediate, hidden]
    down_w:  [hidden, intermediate]
    """
    orig_shape = x.shape
    hidden = orig_shape[-1]
    intermediate = gate_w.shape[0]
    out_dtype = x.dtype

    gen = _tpu_generation()
    tm_pref, ti_pref, vmem_limit, single_buf_io, core_parallel = _gen_config(gen)

    x2d = x.reshape(-1, hidden)
    m = x2d.shape[0]

    x_bytes = jnp.dtype(x.dtype).itemsize
    w_bytes = jnp.dtype(gate_w.dtype).itemsize
    out_bytes = jnp.dtype(out_dtype).itemsize
    io_bufs = 1 if single_buf_io else 2
    budget = int((vmem_limit if vmem_limit is not None else 12 * 2**20) * 0.9)

    # ---- tile selection (row tiles are multiples of 16 for bf16 packing) ----
    if tm is None:
        tm_eff = max(16, min(_round_up(tm_pref, 16), _round_up(m, 16)))
    else:
        tm_eff = max(16, _round_up(tm, 16))

    ti_cands = _ti_candidates(intermediate, ti_pref) if ti is None else [ti]
    ti_eff = None
    while ti_eff is None:
        for cand in ti_cands:   # shrink the reduction tile before the row tile
            if _vmem_need(tm_eff, cand, hidden, x_bytes, w_bytes, out_bytes,
                          io_bufs) <= budget:
                ti_eff = cand
                break
        else:
            if tm_eff > 16:
                tm_eff = max(16, _round_up(tm_eff // 2, 16))
            else:
                ti_eff = ti_cands[-1]   # tiny/odd shapes: take the smallest tile
    assert intermediate % ti_eff == 0
    n_k = intermediate // ti_eff

    m_pad = _round_up(m, tm_eff)
    if m_pad != m:
        x2d = jnp.pad(x2d, ((0, m_pad - m), (0, 0)))
    grid_m = m_pad // tm_eff

    # x/out block indices are constant across the reduction axis; on v7x we
    # single-buffer them to free VMEM for the compute-bound row tile.
    io_mode = dict(pipeline_mode=pl.Buffered(1)) if single_buf_io else {}
    x_spec = pl.BlockSpec((tm_eff, hidden), lambda i, k: (i, 0), **io_mode)
    o_spec = pl.BlockSpec((tm_eff, hidden), lambda i, k: (i, 0), **io_mode)
    wg_spec = pl.BlockSpec((ti_eff, hidden), lambda i, k: (k, 0))
    wu_spec = pl.BlockSpec((ti_eff, hidden), lambda i, k: (k, 0))
    wd_spec = pl.BlockSpec((hidden, ti_eff), lambda i, k: (0, k))

    if core_parallel and grid_m >= 2:
        dim_sem = (pltpu.CORE_PARALLEL, pltpu.ARBITRARY)   # v7x: 2 TCs per chip
    else:
        dim_sem = (pltpu.PARALLEL, pltpu.ARBITRARY)
    cp_kwargs = dict(dimension_semantics=dim_sem)
    if vmem_limit is not None:
        cp_kwargs["vmem_limit_bytes"] = vmem_limit

    out = pl.pallas_call(
        _mlp_kernel,
        out_shape=jax.ShapeDtypeStruct((m_pad, hidden), out_dtype),
        grid_spec=pltpu.PrefetchScalarGridSpec(
            num_scalar_prefetch=0,
            grid=(grid_m, n_k),                     # reduction axis last
            in_specs=[x_spec, wg_spec, wu_spec, wd_spec],
            out_specs=o_spec,
            scratch_shapes=[pltpu.VMEM((tm_eff, hidden), jnp.float32)],
        ),
        compiler_params=pltpu.CompilerParams(**cp_kwargs),
    )(x2d, gate_w, up_w, down_w)

    if m_pad != m:
        out = out[:m]
    return out.reshape(orig_shape)


eff_act_mlp_jit = jax.jit(eff_act_mlp, static_argnames=("tm", "ti"))


if __name__ == "__main__":
    key = jax.random.PRNGKey(0)
    k1, k2, k3, k4 = jax.random.split(key, 4)

    batch, seq, hidden, intermediate = 2, 64, 256, 1024
    dtype = jnp.bfloat16

    x = jax.random.normal(k1, (batch, seq, hidden), jnp.float32).astype(dtype)
    # PyTorch nn.Linear layout (out_features, in_features), fan-in scaled.
    wg = (jax.random.normal(k2, (intermediate, hidden), jnp.float32)
          / jnp.sqrt(hidden)).astype(dtype)
    wu = (jax.random.normal(k3, (intermediate, hidden), jnp.float32)
          / jnp.sqrt(hidden)).astype(dtype)
    wd = (jax.random.normal(k4, (hidden, intermediate), jnp.float32)
          / jnp.sqrt(intermediate)).astype(dtype)

    out = jax.block_until_ready(eff_act_mlp_jit(x, wg, wu, wd))

    # Pure-JAX reference (f32 math, mirrors the kernel's bf16 activation cast).
    xf = x.reshape(-1, hidden).astype(jnp.float32)
    g = xf @ wg.astype(jnp.float32).T
    u = xf @ wu.astype(jnp.float32).T
    h = (g * jax.nn.sigmoid(g) * u).astype(dtype).astype(jnp.float32)
    ref = (h @ wd.astype(jnp.float32).T).reshape(batch, seq, hidden)

    err = float(jnp.max(jnp.abs(out.astype(jnp.float32) - ref)))
    assert err < 0.1, f"max abs err too large: {err}"
    print("KERNEL_OK")
</pallas_src>

<mosaic_0001>
module attributes {stable_mosaic.version = 11 : i64} {
  func.func @_mlp_kernel(%arg0: i32, %arg1: i32, %arg2: memref<128x256xbf16, #tpu.memory_space<vmem>>, %arg3: memref<512x256xbf16, #tpu.memory_space<vmem>>, %arg4: memref<512x256xbf16, #tpu.memory_space<vmem>>, %arg5: memref<256x512xbf16, #tpu.memory_space<vmem>>, %arg6: memref<128x256xbf16, #tpu.memory_space<vmem>>, %arg7: memref<128x256xf32, #tpu.memory_space<vmem>>) attributes {dimension_semantics = [#tpu.dimension_semantics<parallel>, #tpu.dimension_semantics<arbitrary>], iteration_bounds = array<i64: 1, 2>, scalar_prefetch = 0 : i64, scratch_operands = 1 : i64, tpu.core_type = #tpu.core_type<tc>, window_params = [{transform_indices = @transform_0, window_bounds = array<i64: 128, 256>}, {transform_indices = @transform_1, window_bounds = array<i64: 512, 256>}, {transform_indices = @transform_2, window_bounds = array<i64: 512, 256>}, {transform_indices = @transform_3, window_bounds = array<i64: 256, 512>}, {transform_indices = @transform_4, window_bounds = array<i64: 128, 256>}]} {
    %c0_i32 = arith.constant 0 : i32
    %0 = arith.cmpi eq, %arg1, %c0_i32 : i32
    %1 = arith.extui %0 : i1 to i32
    %c0_i32_0 = arith.constant 0 : i32
    %2 = arith.cmpi ne, %1, %c0_i32_0 : i32
    scf.if %2 {
      %cst_18 = arith.constant 0.000000e+00 : f32
      %27 = vector.broadcast %cst_18 : f32 to vector<128x256xf32>
      %c0_19 = arith.constant 0 : index
      %c0_20 = arith.constant 0 : index
      %28 = vector.load %arg7[%c0_19, %c0_20] : memref<128x256xf32, #tpu.memory_space<vmem>>, vector<128x256xf32>
      tpu.vector_store %arg7[%c0_19, %c0_20], %27 {strides = array<i32>} : memref<128x256xf32, #tpu.memory_space<vmem>>, vector<128x256xf32>,
    } else {
    }
    %c0 = arith.constant 0 : index
    %c0_1 = arith.constant 0 : index
    %3 = vector.load %arg2[%c0, %c0_1] : memref<128x256xbf16, #tpu.memory_space<vmem>>, vector<128x256xbf16>
    %c0_2 = arith.constant 0 : index
    %c0_3 = arith.constant 0 : index
    %4 = vector.load %arg3[%c0_2, %c0_3] : memref<512x256xbf16, #tpu.memory_space<vmem>>, vector<512x256xbf16>
    %cst = arith.constant dense<0.000000e+00> : vector<128x512xf32>
    %5 = tpu.matmul %3, %4, %cst {dimension_numbers = #tpu.dot_dimension_numbers<[1], [1], [0], [0], [0, 0, 1, 0], [], []>} : vector<128x256xbf16>, vector<512x256xbf16>, vector<128x512xf32> -> vector<128x512xf32>
    %c0_4 = arith.constant 0 : index
    %c0_5 = arith.constant 0 : index
    %6 = vector.load %arg4[%c0_4, %c0_5] : memref<512x256xbf16, #tpu.memory_space<vmem>>, vector<512x256xbf16>
    %cst_6 = arith.constant dense<0.000000e+00> : vector<128x512xf32>
    %7 = tpu.matmul %3, %6, %cst_6 {dimension_numbers = #tpu.dot_dimension_numbers<[1], [1], [0], [0], [0, 0, 1, 0], [], []>} : vector<128x256xbf16>, vector<512x256xbf16>, vector<128x512xf32> -> vector<128x512xf32>
    %cst_7 = arith.constant 0.000000e+00 : f32
    %8 = vector.broadcast %cst_7 : f32 to vector<128x512xf32>
    %9 = arith.subf %8, %5 : vector<128x512xf32>
    %cst_8 = arith.constant 6.000000e+01 : f32
    %10 = vector.broadcast %cst_8 : f32 to vector<128x512xf32>
    %11 = arith.minimumf %9, %10 : vector<128x512xf32>
    %12 = math.exp %11 : vector<128x512xf32>
    %cst_9 = arith.constant 1.000000e+00 : f32
    %13 = vector.broadcast %cst_9 : f32 to vector<128x512xf32>
    %14 = arith.addf %13, %12 : vector<128x512xf32>
    %15 = tpu.reciprocal %14 {approx = true} : vector<128x512xf32> -> vector<128x512xf32>
    %16 = arith.mulf %5, %15 : vector<128x512xf32>
    %17 = arith.mulf %16, %7 : vector<128x512xf32>
    %18 = arith.truncf %17 : vector<128x512xf32> to vector<128x512xbf16>
    %c0_10 = arith.constant 0 : index
    %c0_11 = arith.constant 0 : index
    %19 = vector.load %arg7[%c0_10, %c0_11] : memref<128x256xf32, #tpu.memory_space<vmem>>, vector<128x256xf32>
    %c0_12 = arith.constant 0 : index
    %c0_13 = arith.constant 0 : index
    %20 = vector.load %arg5[%c0_12, %c0_13] : memref<256x512xbf16, #tpu.memory_space<vmem>>, vector<256x512xbf16>
    %cst_14 = arith.constant dense<0.000000e+00> : vector<128x256xf32>
    %21 = tpu.matmul %18, %20, %cst_14 {dimension_numbers = #tpu.dot_dimension_numbers<[1], [1], [0], [0], [0, 0, 1, 0], [], []>} : vector<128x512xbf16>, vector<256x512xbf16>, vector<128x256xf32> -> vector<128x256xf32>
    %22 = arith.addf %19, %21 : vector<128x256xf32>
    %c0_15 = arith.constant 0 : index
    %c0_16 = arith.constant 0 : index
    %23 = vector.load %arg7[%c0_15, %c0_16] : memref<128x256xf32, #tpu.memory_space<vmem>>, vector<128x256xf32>
    tpu.vector_store %arg7[%c0_15, %c0_16], %22 {strides = array<i32>} : memref<128x256xf32, #tpu.memory_space<vmem>>, vector<128x256xf32>,
    %c1_i32 = arith.constant 1 : i32
    %24 = arith.cmpi eq, %arg1, %c1_i32 : i32
    %25 = arith.extui %24 : i1 to i32
    %c0_i32_17 = arith.constant 0 : i32
    %26 = arith.cmpi ne, %25, %c0_i32_17 : i32
    scf.if %26 {
      %c0_18 = arith.constant 0 : index
      %c0_19 = arith.constant 0 : index
      %27 = vector.load %arg7[%c0_18, %c0_19] : memref<128x256xf32, #tpu.memory_space<vmem>>, vector<128x256xf32>
      %28 = arith.truncf %27 : vector<128x256xf32> to vector<128x256xbf16>
      %c0_20 = arith.constant 0 : index
      %c0_21 = arith.constant 0 : index
      %29 = vector.load %arg6[%c0_20, %c0_21] : memref<128x256xbf16, #tpu.memory_space<vmem>>, vector<128x256xbf16>
      tpu.vector_store %arg6[%c0_20, %c0_21], %28 {strides = array<i32>} : memref<128x256xbf16, #tpu.memory_space<vmem>>, vector<128x256xbf16>,
    } else {
    }
    return
  }
  func.func @transform_0(%arg0: i32, %arg1: i32) -> (i32, i32) {
    %c0_i32 = arith.constant 0 : i32
    %c0_i32_0 = arith.constant 0 : i32
    return %arg0, %c0_i32 : i32, i32
  }
  func.func @transform_1(%arg0: i32, %arg1: i32) -> (i32, i32) {
    %c0_i32 = arith.constant 0 : i32
    %c0_i32_0 = arith.constant 0 : i32
    return %arg1, %c0_i32 : i32, i32
  }
  func.func @transform_2(%arg0: i32, %arg1: i32) -> (i32, i32) {
    %c0_i32 = arith.constant 0 : i32
    %c0_i32_0 = arith.constant 0 : i32
    return %arg1, %c0_i32 : i32, i32
  }
  func.func @transform_3(%arg0: i32, %arg1: i32) -> (i32, i32) {
    %c0_i32 = arith.constant 0 : i32
    %c0_i32_0 = arith.constant 0 : i32
    return %c0_i32, %arg1 : i32, i32
  }
  func.func @transform_4(%arg0: i32, %arg1: i32) -> (i32, i32) {
    %c0_i32 = arith.constant 0 : i32
    %c0_i32_0 = arith.constant 0 : i32
    return %arg0, %c0_i32 : i32, i32
  }
}

</mosaic_0001>

<bundles_post_ra>
// kernel: eff_act_mlp.1
= control target key start
LH: loop header
LB: loop body
LE: loop exit
PB: predicated region body
PF: predicated region fallthrough
CT: control target
= control target key end

     0   :  { %s5353_s0 = inlined_call_operand.hbm [shape: bf16[128,256], index: 0, kind: input, shape index: {}]   ;;  %s5354_s1 = inlined_call_operand.hbm [shape: bf16[1024,256], index: 1, kind: input, shape index: {}]   ;;  %s5355_s2 = inlined_call_operand.hbm [shape: bf16[1024,256], index: 2, kind: input, shape index: {}]   ;;  %s5356_s3 = inlined_call_operand.hbm [shape: bf16[256,1024], index: 3, kind: input, shape index: {}]   ;;  %s5357_s4 = inlined_call_operand.hbm [shape: bf16[128,256], index: 4, kind: output, shape index: {}]  }
   0x1   :  { %5368 = sst [smem:[#allocation16_spill]] %s5354_s1 }
   0x2   :  { %5369 = sst [smem:[#allocation17_spill]] %s5355_s2 }
   0x3   :  { %9 = vsyncpa [#allocation4], 0 }
   0x4   :  { %10 = vsyncpa [#allocation7], 0 }
   0x5   :  { %12 = vsyncpa [#allocation7 + $0x1], 0 }
   0x6   :  { %13 = vsyncpa [#allocation10], 0 }
   0x7   :  { %15 = vsyncpa [#allocation10 + $0x1], 0 }
   0x8   :  { %16 = vsyncpa [#allocation5], 0  ;;  %s4429_s15 = smov 0   ;;  %s4431_s16 = smov 0  }
   0x9   :  { %s4433_s17 = smov 0   ;;  %s4435_s18 = smov 0  }
   0xa   :  { %s4437_s19 = smov 0   ;;  %s4439_s20 = smov 0  }
   0xb LB: > { %s31_s21 = sadd.s32 1, %s4385_s19  ;;  %s67_s22 = sadd.s32 1, %s4377_s17  ;;  %s4389_s20 = sphi %s4439_s20, %s22_s20   ;;  %s4385_s19 = sphi %s4437_s19, %s5391_s19   ;;  %s4381_s18 = sphi %s4435_s18, %s5390_s18   ;;  %s4377_s17 = sphi %s4433_s17, %s5389_s17   ;;  %s4373_s16 = sphi %s4431_s16, %s5388_s16   ;;  %s4369_s15 = sphi %s4429_s15, %s5387_s15  }
   0xc   : > { %p32_p0 = scmp.ge.s32.totalorder %s31_s21, 2  ;;  %p74_p1 = scmp.ne.s32.totalorder %s4377_s17, %s4373_s16 }
   0xd   : > { %p75_p2 = scmp.eq.s32.totalorder %s4389_s20, 0  ;;  %p3542_p5 = scmp.lt.s32.totalorder %s4389_s20, 2 }
   0xe   : > { %s5393_s21 = smov (%p32_p0, %s31_s21), 0  ;;  %s199_s25 = sand.u32 1, %s4389_s20  }
   0xf   : > { %p4466_p3 = por %p75_p2, %p74_p1  ;;  %s64_s24 = ssub.s32 %s4385_s19, %s5393_s21 }
  0x10   : > { %p65_p4 = scmp.eq.s32.totalorder %s64_s24, 0  ;;  %s5358_s26 = sand.u32 1, %s4377_s17  }
  0x11   : > { %s4480_s28 = sshll.u32 %s5358_s26, 9  ;;  %s3461_s29 = sshll.u32 %s4385_s19, 13 }
  0x12   : > { %s4476_s27 = scalar_select %p65_p4, %s4377_s17, %s67_s22  }
  0x13   : > { %s5371_s1 = sld [smem:[#allocation16_spill]]  ;;  %s203_s7 = scalar_lea.vmem [#allocation6], %s4480_s28 }
  0x14   : > { %s211_s8 = sshll.u32 %s203_s7, 4  ;;  %p4493_p6 = pnand %p3542_p5, %p4466_p3  ;;  %s4489_s8 = int_to_ptr.vmem [resolvable:$true] %s211_s8 }
  0x15   : > { %s5373_s2 = sld [smem:[#allocation17_spill]]  ;;  %s4502_s13 = scalar_lea.sflag [#allocation7], %s199_s25 }
  0x16   : > { %s5372_s9 = scalar_select %p4493_p6, 1, 0 }
  0x17   : > { %p4508_p8 = pneg %p4493_p6 }
  0x19   : > { %s4486_s6 = scalar_lea.hbm %s5371_s1, %s3461_s29  ;;  %s4188_s30 = scalar_lea.hbm %s5371_s1, 16384 }
  0x1a   : > { %s4183_s14 = scalar_lea.hbm %s4486_s6, 8192  ;;  %p4189_p11 = scmp.lt.u32.totalorder %s4486_s6, %s5371_s1 }
  0x1b   : > { %s4500_s12 = scalar_lea.hbm %s5373_s2, %s3461_s29  ;;  %p4184_p7 = scmp.ne.s32.totalorder %s4486_s6, %s4183_s14 }
  0x1c   : > { %s5374_s22 = scalar_select %p4508_p8, 1, 0 }
  0x1d   : > { %p4186_p9 = pnand %p4508_p8, %p4184_p7  ;;  %p4190_p12 = scmp.lt.u32.totalorder %s4188_s30, %s4183_s14 }
  0x1e   : > { %p4192_p0 = scmp.lt.u32.totalorder %s4183_s14, %s4486_s6 }
  0x1f   : > { %p4187_p10 = pneg %p4186_p9  ;;  %p4191_p13 = por %p4190_p12, %p4189_p11 }
  0x21   : > { %p4193_p1 = por %p4192_p0, %p4191_p13 }
  0x23   : > { %p4194_p2 = pnand %p4193_p1, %p4187_p10 }
  0x25   : > { %4197 = shalt.err (!%p4194_p2)
}
  0x26   : > { %s4198_s25 = scalar_lea.vmem %s4489_s8, 8192  ;;  %s4391_s7 = smov [#allocation6]  }
  0x27   : > { %p4199_p3 = scmp.ne.s32.totalorder %s4489_s8, %s4198_s25  ;;  %s4203_s10 = sshll.u32 %s4391_s7, 4  ;;  %s4204_s10 = int_to_ptr.vmem [resolvable:$false] %s4203_s10 }
  0x28   : > { %s4205_s11 = scalar_lea.vmem %s4204_s10, 16384  ;;  %p4206_p7 = scmp.lt.s32.totalorder %s4489_s8, %s4204_s10 }
  0x29   : > { %p4201_p4 = pnand %p4199_p3, %p4508_p8  ;;  %p4207_p9 = scmp.lt.s32.totalorder %s4205_s11, %s4198_s25 }
  0x2b   : > { %p4202_p5 = pneg %p4201_p4  ;;  %p4208_p11 = por %p4207_p9, %p4206_p7 }
  0x2d   : > { %p4209_p12 = pnand %p4208_p11, %p4202_p5 }
  0x2f   : > { %4212 = shalt.err (!%p4209_p12)
}
  0x30   : > { %s5359_s14 = smov 128   ;;  %s4393_s23 = smov 8  }
  0x31   : > { %3534 = dma.hbm_to_vmem [thread:$0]  (!%p4493_p6), %s4486_s6, 8192, %s4489_s8, %s4502_s13, %s5359_s14, %s5359_s14, %s4393_s23  }
  0x32   : > { %s4536_s24 = sadd.s32 4294967295, %s4389_s20   ;;  %p80_p10 = scmp.ne.s32.totalorder %s4373_s16, %s4369_s15 }
  0x33   : > { %p5361_p13 = scmp.eq.s32.totalorder %s4536_s24, 0  ;;  %p3211_p0 = scmp.ge.s32.totalorder %s4389_s20, 1 }
  0x34   : > { %p169_p1 = scmp.lt.s32.totalorder %s4389_s20, 3  ;;  %s4394_s8 = smov [#allocation3]  }
  0x35   : > { %p4545_p2 = por %p5361_p13, %p80_p10  ;;  %s185_s5 = sshll.u32 %s4394_s8, 4  ;;  %s4553_s5 = int_to_ptr.vmem [resolvable:$true] %s185_s5 }
  0x36   : > { %p4549_p3 = pnand %p3211_p0, %p169_p1  ;;  %s225_s15 = scalar_lea.vmem [#allocation8], %s4480_s28 }
  0x37   : > { %s5375_s30 = scalar_select %p4545_p2, 1, 0 }
  0x38   : > { %s5376_s6 = scalar_select %p4549_p3, 1, 0 }
  0x39   : > { %p3527_p4 = pneg %p4549_p3  ;;  %s233_s29 = sshll.u32 %s225_s15, 4  ;;  %s4558_s29 = int_to_ptr.vmem [resolvable:$true] %s233_s29 }
  0x3a   : > { %s4213_s7 = scalar_lea.hbm %s4500_s12, 8192  ;;  %s4218_s8 = scalar_lea.hbm %s5373_s2, 16384 }
  0x3b   : > { %p4562_p5 = pnand %p3527_p4, %p5361_p13  ;;  %p4214_p7 = scmp.ne.s32.totalorder %s4500_s12, %s4213_s7 }
  0x3c   : > { %p4219_p12 = scmp.lt.u32.totalorder %s4500_s12, %s5373_s2  ;;  %p4220_p10 = scmp.lt.u32.totalorder %s4218_s8, %s4213_s7 }
  0x3d   : > { %s5377_s25 = scalar_select %p4562_p5, 1, 0 }
  0x3e   : > { %p4216_p9 = pnand %p4214_p7, %p4508_p8  ;;  %p4221_p0 = por %p4220_p10, %p4219_p12 }
  0x3f   : > { %p4222_p1 = scmp.lt.u32.totalorder %s4213_s7, %s4500_s12 }
  0x40   : > { %p4217_p11 = pneg %p4216_p9 }
  0x41   : > { %p4223_p4 = por %p4222_p1, %p4221_p0 }
  0x43   : > { %p4224_p13 = pnand %p4223_p4, %p4217_p11 }
  0x45   : > { %4227 = shalt.err (!%p4224_p13)
}
  0x46   : > { %s4228_s15 = scalar_lea.vmem %s4558_s29, 8192  ;;  %s4395_s10 = smov [#allocation8]  }
  0x47   : > { %p4229_p7 = scmp.ne.s32.totalorder %s4558_s29, %s4228_s15  ;;  %s4233_s11 = sshll.u32 %s4395_s10, 4  ;;  %s4234_s11 = int_to_ptr.vmem [resolvable:$false] %s4233_s11 }
  0x48   : > { %s4235_s26 = scalar_lea.vmem %s4234_s11, 16384  ;;  %p4236_p3 = scmp.lt.s32.totalorder %s4558_s29, %s4234_s11 }
  0x49   : > { %p4231_p9 = pnand %p4229_p7, %p4508_p8  ;;  %p4237_p5 = scmp.lt.s32.totalorder %s4235_s26, %s4228_s15 }
  0x4b   : > { %p4232_p2 = pneg %p4231_p9  ;;  %p4238_p12 = por %p4237_p5, %p4236_p3 }
  0x4d   : > { %p4239_p10 = pnand %p4238_p12, %p4232_p2 }
  0x4f   : > { %4242 = shalt.err (!%p4239_p10)
}
  0x50   : > { %s5378_s14 = smov 128   ;;  %s3464_s7 = sshll.u32 %s4385_s19, 8 }
  0x51   : > { %3537 = dma.hbm_to_vmem [thread:$0]  (!%p4493_p6), %s4500_s12, 8192, %s4558_s29, %s4502_s13, %s5378_s14, %s5378_s14, %s4393_s23  }
  0x52   : > { %s4243_s11 = scalar_lea.hbm %s5353_s0, 2048  ;;  %p5379_p2 = scmp.ne.s32.totalorder %s5377_s25, 0 }
  0x53   : > { %p4244_p13 = scmp.ne.s32.totalorder %s5353_s0, %s4243_s11  ;;  %p4250_p0 = scmp.lt.u32.totalorder %s4243_s11, %s5353_s0 }
  0x54   : > { %p4245_p3 = pneg %p5379_p2 }
  0x56   : > { %p4246_p5 = pnand %p4245_p3, %p4244_p13 }
  0x58   : > { %p4247_p11 = pneg %p4246_p5 }
  0x5a   : > { %p4252_p1 = pnand %p4250_p0, %p4247_p11 }
  0x5c   : > { %4255 = shalt.err (!%p4252_p1)
}
  0x5d   : > { %s4256_s12 = scalar_lea.vmem %s4553_s5, 2048  ;;  %p4264_p12 = scmp.lt.s32.totalorder %s4553_s5, %s4553_s5 }
  0x5e   : > { %p4257_p4 = scmp.ne.s32.totalorder %s4553_s5, %s4256_s12  ;;  %p4265_p10 = scmp.lt.s32.totalorder %s4256_s12, %s4256_s12 }
  0x60   : > { %p4259_p7 = pnand %p4257_p4, %p4245_p3  ;;  %p4266_p6 = por %p4265_p10, %p4264_p12 }
  0x62   : > { %p4260_p9 = pneg %p4259_p7 }
  0x64   : > { %p4267_p8 = pnand %p4266_p6, %p4260_p9 }
  0x66   : > { %4270 = shalt.err (!%p4267_p8)
}
  0x67   : > { %3530 = dma.hbm_to_vmem [thread:$0]  (!%p5379_p2), %s5353_s0, 2048, %s4553_s5, [#allocation4], %s5378_s14, %s5378_s14, %s4393_s23  }
  0x68   : > { %s4619_s8 = scalar_lea.hbm %s5356_s3, %s3464_s7  ;;  %s247_s25 = scalar_lea.vmem [#allocation9], %s4480_s28 }
  0x69   : > { %s254_s10 = sshll.u32 %s247_s25, 4  ;;  %s5380_s11 = sand.u32 1, %s4377_s17   ;;  %s4622_s10 = int_to_ptr.vmem [resolvable:$true] %s254_s10 }
  0x6a   : > { %s4626_s15 = scalar_lea.sflag [#allocation10], %s5380_s11  ;;  %s4271_s26 = scalar_lea.hbm %s4619_s8, 8192 }
  0x6b   : > { %p4272_p6 = scmp.ne.s32.totalorder %s4619_s8, %s4271_s26  ;;  %p5381_p8 = scmp.ne.s32.totalorder %s5374_s22, 0 }
  0x6c   : > { %s4276_s14 = scalar_lea.hbm %s5356_s3, 16384  ;;  %p4277_p3 = scmp.lt.u32.totalorder %s4619_s8, %s5356_s3 }
  0x6d   : > { %p4274_p13 = pnand %p4272_p6, %p5381_p8  ;;  %p4278_p5 = scmp.lt.u32.totalorder %s4276_s14, %s4271_s26 }
  0x6e   : > { %p4280_p0 = scmp.lt.u32.totalorder %s4271_s26, %s4619_s8 }
  0x6f   : > { %p4275_p2 = pneg %p4274_p13  ;;  %p4279_p11 = por %p4278_p5, %p4277_p3 }
  0x71   : > { %p4281_p1 = por %p4280_p0, %p4279_p11 }
  0x73   : > { %p4282_p4 = pnand %p4281_p1, %p4275_p2 }
  0x75   : > { %4285 = shalt.err (!%p4282_p4)
}
  0x76   : > { %s4286_s28 = scalar_lea.vmem %s4622_s10, 8192  ;;  %s4396_s1 = smov [#allocation9]  }
  0x77   : > { %p4287_p7 = scmp.ne.s32.totalorder %s4622_s10, %s4286_s28  ;;  %s4291_s2 = sshll.u32 %s4396_s1, 4  ;;  %s4292_s2 = int_to_ptr.vmem [resolvable:$false] %s4291_s2 }
  0x78   : > { %s4293_s13 = scalar_lea.vmem %s4292_s2, 16384  ;;  %p4294_p10 = scmp.lt.s32.totalorder %s4622_s10, %s4292_s2 }
  0x79   : > { %p4289_p9 = pnand %p4287_p7, %p5381_p8  ;;  %p4295_p6 = scmp.lt.s32.totalorder %s4293_s13, %s4286_s28 }
  0x7b   : > { %p4290_p12 = pneg %p4289_p9  ;;  %p4296_p13 = por %p4295_p6, %p4294_p10 }
  0x7d   : > { %p4297_p3 = pnand %p4296_p13, %p4290_p12 }
  0x7f   : > { %4300 = shalt.err (!%p4297_p3)
}
  0x80   : > { %s4397_s29 = smov 512   ;;  %s4398_s25 = smov 256  }
  0x81   : > { %s4399_s11 = smov 16   ;;  %p5382_p2 = scmp.ne.s32.totalorder %s5372_s9, 0 }
  0x82   : > { %p5383_p8 = scmp.ne.s32.totalorder %s5376_s6, 0 }
  0x83   : > { %3540 = dma.hbm_to_vmem [thread:$0]  (!%p5382_p2), %s4619_s8, 8192, %s4622_s10, %s4626_s15, %s4397_s29, %s4398_s25, %s4399_s11  }
  0x84   : > { %266 = sbr.rel (%p5383_p8) target bundleno = 1081 (0x439), region = 36  ;;  %p5384_p5 = scmp.eq.s32.totalorder (!%p5383_p8), %s4536_s24, 0 }
  0x8b   : > { %4352 = dma.done.wait (%p5384_p5), [#allocation4], 2048   ;;  %p5385_p11 = pmov %p5384_p5 }
  0x8c   : > { %s272_s22 = sand.u32 1, %s4536_s24   ;;  %s274_s26 = sand.u32 1, %s4373_s16  }
  0x8d   : > { %4354 = vsyncadd (%p5385_p11), [#allocation4], 4294965248  ;;  %s3227_s23 = sshll.u32 %s274_s26, 9  ;;  %s273_s5 = scalar_lea.sflag [#allocation7], %s272_s22 }
  0x8e   : > { %s4658_s14 = scalar_lea.vmem [#allocation6], %s3227_s23  ;;  %p5386_p0 = scmp.ne.s32.totalorder %s5375_s30, 0 }
  0x90   : > { %4356 = dma.done.wait (%p5386_p0), %s273_s5, 16384  }
  0x91   : > { %4358 = vsyncadd (%p5386_p0), %s273_s5, 4294950912  ;;  %s4664_s9 = scalar_lea.vmem [#allocation8], %s3227_s23  ;;  %s291_s6 = scalar_lea.sflag [#allocation10], %s274_s26 }
  0x92   : > { %s4666_s8 = scalar_lea.vmem [#allocation9], %s3227_s23 }
  0x93   : > { %4360 = dma.done.wait (%p5386_p0), %s291_s6, 8192  }
  0x94   : > { %4362 = vsyncadd (%p5386_p0), %s291_s6, 4294959104  ;;  %p3230_p1 = scmp.ne.s32.totalorder %s4381_s18, 0 }
  0x95   : > { %v4400_v0 = vmov (!%p3230_p1), 0.0  }
  0x96   : > { %332 = sbr.rel (%p3230_p1) target bundleno = 166 (0xa6), region = 56  ;;  %333 = vst [vmem:[#allocation2] sm:$0xff] (!%p3230_p1), %v4400_v0  ;;  %334 = vst [vmem:[#allocation2 + $0x8] sm:$0xff] (!%p3230_p1), %v4400_v0 }
  0x97   : > { %335 = vst [vmem:[#allocation2 + $0x10] sm:$0xff] (!%p3230_p1), %v4400_v0  ;;  %336 = vst [vmem:[#allocation2 + $0x18] sm:$0xff] (!%p3230_p1), %v4400_v0 }
  0x98   : > { %337 = vst [vmem:[#allocation2 + $0x20] sm:$0xff] (!%p3230_p1), %v4400_v0  ;;  %338 = vst [vmem:[#allocation2 + $0x28] sm:$0xff] (!%p3230_p1), %v4400_v0 }
  0x99   : > { %339 = vst [vmem:[#allocation2 + $0x30] sm:$0xff] (!%p3230_p1), %v4400_v0  ;;  %340 = vst [vmem:[#allocation2 + $0x38] sm:$0xff] (!%p3230_p1), %v4400_v0 }
  0x9a   : > { %341 = vst [vmem:[#allocation2 + $0x40] sm:$0xff] (!%p3230_p1), %v4400_v0  ;;  %342 = vst [vmem:[#allocation2 + $0x48] sm:$0xff] (!%p3230_p1), %v4400_v0 }
  0x9b   : > { %343 = vst [vmem:[#allocation2 + $0x50] sm:$0xff] (!%p3230_p1), %v4400_v0  ;;  %344 = vst [vmem:[#allocation2 + $0x58] sm:$0xff] (!%p3230_p1), %v4400_v0 }
  0x9c   : > { %345 = vst [vmem:[#allocation2 + $0x60] sm:$0xff] (!%p3230_p1), %v4400_v0  ;;  %346 = vst [vmem:[#allocation2 + $0x68] sm:$0xff] (!%p3230_p1), %v4400_v0 }
  0x9d   : > { %347 = vst [vmem:[#allocation2 + $0x70] sm:$0xff] %v4400_v0  ;;  %348 = vst [vmem:[#allocation2 + $0x78] sm:$0xff] %v4400_v0 }
  0x9e   : > { %349 = vst [vmem:[#allocation2 + $0x80] sm:$0xff] %v4400_v0  ;;  %350 = vst [vmem:[#allocation2 + $0x88] sm:$0xff] %v4400_v0 }
  0x9f   : > { %351 = vst [vmem:[#allocation2 + $0x90] sm:$0xff] %v4400_v0  ;;  %352 = vst [vmem:[#allocation2 + $0x98] sm:$0xff] %v4400_v0 }
  0xa0   : > { %353 = vst [vmem:[#allocation2 + $0xa0] sm:$0xff] %v4400_v0  ;;  %354 = vst [vmem:[#allocation2 + $0xa8] sm:$0xff] %v4400_v0 }
  0xa1   : > { %355 = vst [vmem:[#allocation2 + $0xb0] sm:$0xff] %v4400_v0  ;;  %356 = vst [vmem:[#allocation2 + $0xb8] sm:$0xff] %v4400_v0 }
  0xa2   : > { %357 = vst [vmem:[#allocation2 + $0xc0] sm:$0xff] %v4400_v0  ;;  %358 = vst [vmem:[#allocation2 + $0xc8] sm:$0xff] %v4400_v0 }
  0xa3   : > { %359 = vst [vmem:[#allocation2 + $0xd0] sm:$0xff] %v4400_v0  ;;  %360 = vst [vmem:[#allocation2 + $0xd8] sm:$0xff] %v4400_v0 }
  0xa4   : > { %361 = vst [vmem:[#allocation2 + $0xe0] sm:$0xff] %v4400_v0  ;;  %362 = vst [vmem:[#allocation2 + $0xe8] sm:$0xff] %v4400_v0 }
  0xa5   : > { %363 = vst [vmem:[#allocation2 + $0xf0] sm:$0xff] %v4400_v0  ;;  %364 = vst [vmem:[#allocation2 + $0xf8] sm:$0xff] %v4400_v0 }
  0xa6 PF: > { %v3604_v1 = vld [vmem:[%s4658_s14 + $0x4] ss:$8 sps:$4 sm:$0xff]   ;;  %v3606_v2 = vld [vmem:[%s4658_s14] ss:$8 sps:$4 sm:$0xff]   ;;  %v3607_v3 = vld [vmem:[%s4658_s14 + $0x14] ss:$8 sps:$4 sm:$0xff]  }
  0xa7   : > { %845 = vmatprep.subr.bf16.mxu1 %v3604_v1  ;;  %v3609_v4 = vld [vmem:[%s4658_s14 + $0x10] ss:$8 sps:$4 sm:$0xff]   ;;  %v3618_v5 = vld [vmem:[%s4664_s9 + $0x4] ss:$8 sps:$4 sm:$0xff]   ;;  %v3621_v6 = vld [vmem:[%s4664_s9] ss:$8 sps:$4 sm:$0xff]  }
  0xa8   : > { %846 = vmatpush1.bf16.xpose.msra.mxu1 %v3606_v2  ;;  %v3610_v7 = vld [vmem:[%s4658_s14 + $0x24] ss:$8 sps:$4 sm:$0xff]   ;;  %1455 = vmatprep.subr.bf16.mxu0 %v3618_v5  ;;  %v3624_v8 = vld [vmem:[%s4664_s9 + $0x14] ss:$8 sps:$4 sm:$0xff]   ;;  %v3627_v9 = vld [vmem:[%s4664_s9 + $0x10] ss:$8 sps:$4 sm:$0xff]  }
  0xa9   : > { %847 = vmatprep.subr.bf16.mxu1 %v3607_v3  ;;  %1456 = vmatpush1.bf16.xpose.msra.mxu0 %v3621_v6  ;;  %v3612_v10 = vld [vmem:[%s4658_s14 + $0x20] ss:$8 sps:$4 sm:$0xff]   ;;  %v3630_v11 = vld [vmem:[%s4664_s9 + $0x24] ss:$8 sps:$4 sm:$0xff]   ;;  %v3613_v12 = vld [vmem:[%s4658_s14 + $0x34] ss:$8 sps:$4 sm:$0xff]  }
  0xaa   : > { %1457 = vmatprep.subr.bf16.mxu0 %v3624_v8  ;;  %v3633_v13 = vld [vmem:[%s4664_s9 + $0x20] ss:$8 sps:$4 sm:$0xff]   ;;  %v3615_v14 = vld [vmem:[%s4658_s14 + $0x30] ss:$8 sps:$4 sm:$0xff]   ;;  %v3636_v15 = vld [vmem:[%s4664_s9 + $0x34] ss:$8 sps:$4 sm:$0xff]  }
  0xab   : > { %v3616_v16 = vld [vmem:[%s4658_s14 + $0x44] ss:$8 sps:$4 sm:$0xff]   ;;  %v3639_v17 = vld [vmem:[%s4664_s9 + $0x30] ss:$8 sps:$4 sm:$0xff]   ;;  %v3620_v18 = vld [vmem:[%s4658_s14 + $0x40] ss:$8 sps:$4 sm:$0xff]  }
  0xac   : > { %v3642_v19 = vld [vmem:[%s4664_s9 + $0x44] ss:$8 sps:$4 sm:$0xff]   ;;  %v3622_v20 = vld [vmem:[%s4658_s14 + $0x54] ss:$8 sps:$4 sm:$0xff]   ;;  %v3645_v21 = vld [vmem:[%s4664_s9 + $0x40] ss:$8 sps:$4 sm:$0xff]  }
  0xad   : > { %v4694_v22 = vld [vmem:[#allocation3 + $0x4] ss:$8 sps:$4 sm:$0xff]   ;;  %v3626_v23 = vld [vmem:[%s4658_s14 + $0x50] ss:$8 sps:$4 sm:$0xff]   ;;  %v3648_v24 = vld [vmem:[%s4664_s9 + $0x54] ss:$8 sps:$4 sm:$0xff]  }
  0xae   : > { %v3628_v25 = vld [vmem:[%s4658_s14 + $0x64] ss:$8 sps:$4 sm:$0xff]   ;;  %877 = vmatprep.mubr.bf16.mxu1 %v4694_v22  ;;  %1487 = vmatprep.mubr.bf16.mxu0 %v4694_v22  ;;  %v3651_v26 = vld [vmem:[%s4664_s9 + $0x50] ss:$8 sps:$4 sm:$0xff]   ;;  %v3632_v27 = vld [vmem:[%s4658_s14 + $0x60] ss:$8 sps:$4 sm:$0xff]  }
  0xaf   : > { %v3654_v28 = vld [vmem:[%s4664_s9 + $0x64] ss:$8 sps:$4 sm:$0xff]   ;;  %v3634_v29 = vld [vmem:[%s4658_s14 + $0x74] ss:$8 sps:$4 sm:$0xff]   ;;  %v3657_v30 = vld [vmem:[%s4664_s9 + $0x60] ss:$8 sps:$4 sm:$0xff]  }
  0xb0   : > { %848 = vmatpush1.bf16.xpose.msra.mxu1 %v3609_v4  ;;  %v3638_v31 = vld [vmem:[%s4658_s14 + $0x70] ss:$8 sps:$4 sm:$0xff]   ;;  %v3660_v32 = vld [vmem:[%s4664_s9 + $0x74] ss:$8 sps:$4 sm:$0xff]   ;;  %v3640_v33 = vld [vmem:[%s4658_s14 + $0x84] ss:$8 sps:$4 sm:$0xff]  }
  0xb1   : > { %849 = vmatprep.subr.bf16.mxu1 %v3610_v7  ;;  %1458 = vmatpush1.bf16.xpose.msra.mxu0 %v3627_v9  ;;  %v3663_v34 = vld [vmem:[%s4664_s9 + $0x70] ss:$8 sps:$4 sm:$0xff]   ;;  %v3644_v35 = vld [vmem:[%s4658_s14 + $0x80] ss:$8 sps:$4 sm:$0xff]   ;;  %v3666_v36 = vld [vmem:[%s4664_s9 + $0x84] ss:$8 sps:$4 sm:$0xff]  }
  0xb2   : > { %1459 = vmatprep.subr.bf16.mxu0 %v3630_v11  ;;  %v3646_v37 = vld [vmem:[%s4658_s14 + $0x94] ss:$8 sps:$4 sm:$0xff]   ;;  %v3669_v38 = vld [vmem:[%s4664_s9 + $0x80] ss:$8 sps:$4 sm:$0xff]   ;;  %v3650_v39 = vld [vmem:[%s4658_s14 + $0x90] ss:$8 sps:$4 sm:$0xff]  }
  0xb3   : > { %v3672_v40 = vld [vmem:[%s4664_s9 + $0x94] ss:$8 sps:$4 sm:$0xff]   ;;  %v3652_v41 = vld [vmem:[%s4658_s14 + $0xa4] ss:$8 sps:$4 sm:$0xff]   ;;  %v3675_v42 = vld [vmem:[%s4664_s9 + $0x90] ss:$8 sps:$4 sm:$0xff]  }
  0xb4   : > { %v3656_v43 = vld [vmem:[%s4658_s14 + $0xa0] ss:$8 sps:$4 sm:$0xff]   ;;  %v3678_v44 = vld [vmem:[%s4664_s9 + $0xa4] ss:$8 sps:$4 sm:$0xff]   ;;  %v3658_v45 = vld [vmem:[%s4658_s14 + $0xb4] ss:$8 sps:$4 sm:$0xff]  }
  0xb5   : > { %v3681_v46 = vld [vmem:[%s4664_s9 + $0xa0] ss:$8 sps:$4 sm:$0xff]   ;;  %v3662_v47 = vld [vmem:[%s4658_s14 + $0xb0] ss:$8 sps:$4 sm:$0xff]   ;;  %v3684_v48 = vld [vmem:[%s4664_s9 + $0xb4] ss:$8 sps:$4 sm:$0xff]  }
  0xb6   : > { %v3664_v49 = vld [vmem:[%s4658_s14 + $0xc4] ss:$8 sps:$4 sm:$0xff]   ;;  %v3687_v50 = vld [vmem:[%s4664_s9 + $0xb0] ss:$8 sps:$4 sm:$0xff]   ;;  %v3668_v51 = vld [vmem:[%s4658_s14 + $0xc0] ss:$8 sps:$4 sm:$0xff]  }
  0xb7   : > { %v3694_v52 = vld [vmem:[%s4664_s9 + $0xc4] ss:$8 sps:$4 sm:$0xff]   ;;  %v3670_v53 = vld [vmem:[%s4658_s14 + $0xd4] ss:$8 sps:$4 sm:$0xff]   ;;  %v3696_v54 = vld [vmem:[%s4664_s9 + $0xc0] ss:$8 sps:$4 sm:$0xff]  }
  0xb8   : > { %850 = vmatpush1.bf16.xpose.msra.mxu1 %v3612_v10  ;;  %v3674_v55 = vld [vmem:[%s4658_s14 + $0xd0] ss:$8 sps:$4 sm:$0xff]   ;;  %v3700_v56 = vld [vmem:[%s4664_s9 + $0xd4] ss:$8 sps:$4 sm:$0xff]   ;;  %v3676_v57 = vld [vmem:[%s4658_s14 + $0xe4] ss:$8 sps:$4 sm:$0xff]  }
  0xb9   : > { %851 = vmatprep.subr.bf16.mxu1 %v3613_v12  ;;  %1460 = vmatpush1.bf16.xpose.msra.mxu0 %v3633_v13  ;;  %v3702_v58 = vld [vmem:[%s4664_s9 + $0xd0] ss:$8 sps:$4 sm:$0xff]   ;;  %v3680_v59 = vld [vmem:[%s4658_s14 + $0xe0] ss:$8 sps:$4 sm:$0xff]   ;;  %v3706_v60 = vld [vmem:[%s4664_s9 + $0xe4] ss:$8 sps:$4 sm:$0xff]  }
  0xba   : > { %1461 = vmatprep.subr.bf16.mxu0 %v3636_v15  ;;  %v3682_v61 = vld [vmem:[%s4658_s14 + $0xf4] ss:$8 sps:$4 sm:$0xff]   ;;  %v3708_v62 = vld [vmem:[%s4664_s9 + $0xe0] ss:$8 sps:$4 sm:$0xff]   ;;  %v3686_v63 = vld [vmem:[%s4658_s14 + $0xf0] ss:$8 sps:$4 sm:$0xff]  }
  0xbb   : > { %v3712_v0 = vld [vmem:[%s4664_s9 + $0xf4] ss:$8 sps:$4 sm:$0xff]   ;;  %v3693_v1 = vld [vmem:[%s4658_s14 + $0x104] ss:$8 sps:$4 sm:$0xff]   ;;  %v4741_v2 = vld [vmem:[#allocation3] ss:$8 sps:$4 sm:$0xff]  }
  0xbc   : > { %v3714_v3 = vld [vmem:[%s4664_s9 + $0xf0] ss:$8 sps:$4 sm:$0xff]   ;;  %v3691_v4 = vld [vmem:[%s4658_s14 + $0x100] ss:$8 sps:$4 sm:$0xff]   ;;  %v4745_v5 = vld [vmem:[#allocation3 + $0x14] ss:$8 sps:$4 sm:$0xff]  }
  0xbd   : > { %v3699_v6 = vld [vmem:[%s4658_s14 + $0x114] ss:$8 sps:$4 sm:$0xff]   ;;  %v4751_v8 = vld [vmem:[#allocation3 + $0x10] ss:$8 sps:$4 sm:$0xff]   ;;  %v4754_v10 = vld [vmem:[#allocation3 + $0x24] ss:$8 sps:$4 sm:$0xff]  }
  0xbe   : > { %v3774_v7 = vld [vmem:[%s4666_s8 + $0x4] ss:$16 sps:$4 sm:$0xff]   ;;  %v3697_v9 = vld [vmem:[%s4658_s14 + $0x110] ss:$8 sps:$4 sm:$0xff]   ;;  %v3703_v15 = vld [vmem:[%s4658_s14 + $0x120] ss:$8 sps:$4 sm:$0xff]  }
  0xbf   : > { %v3705_v11 = vld [vmem:[%s4658_s14 + $0x124] ss:$8 sps:$4 sm:$0xff]   ;;  %v3772_v12 = vld [vmem:[%s4666_s8] ss:$16 sps:$4 sm:$0xff]   ;;  %p3439_p4 = scmp.ne.s32.totalorder %s4381_s18, 1 }
  0xc0   : > { %852 = vmatpush1.bf16.xpose.msra.mxu1 %v3615_v14  ;;  %v3780_v13 = vld [vmem:[%s4666_s8 + $0x24] ss:$16 sps:$4 sm:$0xff]   ;;  %v4763_v14 = vld [vmem:[#allocation3 + $0x20] ss:$8 sps:$4 sm:$0xff]  }
  0xc1   : > { %853 = vmatprep.subr.bf16.mxu1 %v3616_v16  ;;  %1462 = vmatpush1.bf16.xpose.msra.mxu0 %v3639_v17  ;;  %v4766_v16 = vld [vmem:[#allocation3 + $0x34] ss:$8 sps:$4 sm:$0xff]  }
  0xc2   : > { %1463 = vmatprep.subr.bf16.mxu0 %v3642_v19  ;;  %v3711_v17 = vld [vmem:[%s4658_s14 + $0x134] ss:$8 sps:$4 sm:$0xff]  }
  0xc3   : > { %v3786_v19 = vld [vmem:[%s4666_s8 + $0x44] ss:$16 sps:$4 sm:$0xff]  }
  0xc8   : > { %854 = vmatpush1.bf16.xpose.msra.mxu1 %v3620_v18  ;;  %v3778_v18 = vld [vmem:[%s4666_s8 + $0x20] ss:$16 sps:$4 sm:$0xff]  }
  0xc9   : > { %855 = vmatprep.subr.bf16.mxu1 %v3622_v20  ;;  %1464 = vmatpush1.bf16.xpose.msra.mxu0 %v3645_v21  ;;  %v4775_v20 = vld [vmem:[#allocation3 + $0x30] ss:$8 sps:$4 sm:$0xff]  }
  0xca   : > { %1465 = vmatprep.subr.bf16.mxu0 %v3648_v24  ;;  %v3709_v21 = vld [vmem:[%s4658_s14 + $0x130] ss:$8 sps:$4 sm:$0xff]   ;;  %v3717_v24 = vld [vmem:[%s4658_s14 + $0x144] ss:$8 sps:$4 sm:$0xff]  }
  0xd0   : > { %856 = vmatpush1.bf16.xpose.msra.mxu1 %v3626_v23  ;;  %v4778_v23 = vld [vmem:[#allocation3 + $0x44] ss:$8 sps:$4 sm:$0xff]  }
  0xd1   : > { %857 = vmatprep.subr.bf16.mxu1 %v3628_v25  ;;  %1466 = vmatpush1.bf16.xpose.msra.mxu0 %v3651_v26  ;;  %v3784_v25 = vld [vmem:[%s4666_s8 + $0x40] ss:$16 sps:$4 sm:$0xff]   ;;  %v3792_v26 = vld [vmem:[%s4666_s8 + $0x64] ss:$16 sps:$4 sm:$0xff]  }
  0xd2   : > { %1467 = vmatprep.subr.bf16.mxu0 %v3654_v28  ;;  %v3715_v28 = vld [vmem:[%s4658_s14 + $0x140] ss:$8 sps:$4 sm:$0xff]  }
  0xd8   : > { %858 = vmatpush1.bf16.xpose.msra.mxu1 %v3632_v27  ;;  %v4787_v27 = vld [vmem:[#allocation3 + $0x40] ss:$8 sps:$4 sm:$0xff]  }
  0xd9   : > { %859 = vmatprep.subr.bf16.mxu1 %v3634_v29  ;;  %1468 = vmatpush1.bf16.xpose.msra.mxu0 %v3657_v30  ;;  %v4790_v29 = vld [vmem:[#allocation3 + $0x54] ss:$8 sps:$4 sm:$0xff]  }
  0xda   : > { %1469 = vmatprep.subr.bf16.mxu0 %v3660_v32  ;;  %v3723_v30 = vld [vmem:[%s4658_s14 + $0x154] ss:$8 sps:$4 sm:$0xff]  }
  0xdb   : > { %v3798_v32 = vld [vmem:[%s4666_s8 + $0x84] ss:$16 sps:$4 sm:$0xff]  }
  0xe0   : > { %860 = vmatpush1.bf16.xpose.msra.mxu1 %v3638_v31  ;;  %v3790_v31 = vld [vmem:[%s4666_s8 + $0x60] ss:$16 sps:$4 sm:$0xff]  }
  0xe1   : > { %861 = vmatprep.subr.bf16.mxu1 %v3640_v33  ;;  %1470 = vmatpush1.bf16.xpose.msra.mxu0 %v3663_v34  ;;  %v4799_v33 = vld [vmem:[#allocation3 + $0x50] ss:$8 sps:$4 sm:$0xff]  }
  0xe2   : > { %1471 = vmatprep.subr.bf16.mxu0 %v3666_v36  ;;  %v3721_v34 = vld [vmem:[%s4658_s14 + $0x150] ss:$8 sps:$4 sm:$0xff]   ;;  %v3729_v36 = vld [vmem:[%s4658_s14 + $0x164] ss:$8 sps:$4 sm:$0xff]  }
  0xe8   : > { %862 = vmatpush1.bf16.xpose.msra.mxu1 %v3644_v35  ;;  %v4802_v35 = vld [vmem:[#allocation3 + $0x64] ss:$8 sps:$4 sm:$0xff]  }
  0xe9   : > { %863 = vmatprep.subr.bf16.mxu1 %v3646_v37  ;;  %1472 = vmatpush1.bf16.xpose.msra.mxu0 %v3669_v38  ;;  %v3796_v37 = vld [vmem:[%s4666_s8 + $0x80] ss:$16 sps:$4 sm:$0xff]   ;;  %v3804_v38 = vld [vmem:[%s4666_s8 + $0xa4] ss:$16 sps:$4 sm:$0xff]  }
  0xea   : > { %1473 = vmatprep.subr.bf16.mxu0 %v3672_v40  ;;  %v3727_v40 = vld [vmem:[%s4658_s14 + $0x160] ss:$8 sps:$4 sm:$0xff]  }
  0xf0   : > { %864 = vmatpush1.bf16.xpose.msra.mxu1 %v3650_v39  ;;  %v4811_v39 = vld [vmem:[#allocation3 + $0x60] ss:$8 sps:$4 sm:$0xff]  }
  0xf1   : > { %865 = vmatprep.subr.bf16.mxu1 %v3652_v41  ;;  %1474 = vmatpush1.bf16.xpose.msra.mxu0 %v3675_v42  ;;  %v4814_v41 = vld [vmem:[#allocation3 + $0x74] ss:$8 sps:$4 sm:$0xff]  }
  0xf2   : > { %1475 = vmatprep.subr.bf16.mxu0 %v3678_v44  ;;  %v3735_v42 = vld [vmem:[%s4658_s14 + $0x174] ss:$8 sps:$4 sm:$0xff]  }
  0xf3   : > { %v3810_v44 = vld [vmem:[%s4666_s8 + $0xc4] ss:$16 sps:$4 sm:$0xff]  }
  0xf8   : > { %866 = vmatpush1.bf16.xpose.msra.mxu1 %v3656_v43  ;;  %v3802_v43 = vld [vmem:[%s4666_s8 + $0xa0] ss:$16 sps:$4 sm:$0xff]  }
  0xf9   : > { %867 = vmatprep.subr.bf16.mxu1 %v3658_v45  ;;  %1476 = vmatpush1.bf16.xpose.msra.mxu0 %v3681_v46  ;;  %v4823_v45 = vld [vmem:[#allocation3 + $0x70] ss:$8 sps:$4 sm:$0xff]  }
  0xfa   : > { %1477 = vmatprep.subr.bf16.mxu0 %v3684_v48  ;;  %v3733_v46 = vld [vmem:[%s4658_s14 + $0x170] ss:$8 sps:$4 sm:$0xff]  }
  0xfb   : > { %v3808_v48 = vld [vmem:[%s4666_s8 + $0xc0] ss:$16 sps:$4 sm:$0xff]  }
 0x100   : > { %868 = vmatpush1.bf16.xpose.msra.mxu1 %v3662_v47  ;;  %v3741_v47 = vld [vmem:[%s4658_s14 + $0x184] ss:$8 sps:$4 sm:$0xff]  }
 0x101   : > { %869 = vmatprep.subr.bf16.mxu1 %v3664_v49  ;;  %1478 = vmatpush1.bf16.xpose.msra.mxu0 %v3687_v50  ;;  %v3816_v49 = vld [vmem:[%s4666_s8 + $0xe4] ss:$16 sps:$4 sm:$0xff]   ;;  %v3739_v50 = vld [vmem:[%s4658_s14 + $0x180] ss:$8 sps:$4 sm:$0xff]  }
 0x102   : > { %1479 = vmatprep.subr.bf16.mxu0 %v3694_v52  ;;  %v3814_v52 = vld [vmem:[%s4666_s8 + $0xe0] ss:$16 sps:$4 sm:$0xff]  }
 0x108   : > { %870 = vmatpush1.bf16.xpose.msra.mxu1 %v3668_v51  ;;  %v3747_v51 = vld [vmem:[%s4658_s14 + $0x194] ss:$8 sps:$4 sm:$0xff]  }
 0x109   : > { %871 = vmatprep.subr.bf16.mxu1 %v3670_v53  ;;  %1480 = vmatpush1.bf16.xpose.msra.mxu0 %v3696_v54  ;;  %v3822_v53 = vld [vmem:[%s4666_s8 + $0x104] ss:$16 sps:$4 sm:$0xff]   ;;  %v3745_v54 = vld [vmem:[%s4658_s14 + $0x190] ss:$8 sps:$4 sm:$0xff]  }
 0x10a   : > { %1481 = vmatprep.subr.bf16.mxu0 %v3700_v56  ;;  %v3820_v56 = vld [vmem:[%s4666_s8 + $0x100] ss:$16 sps:$4 sm:$0xff]  }
 0x110   : > { %872 = vmatpush1.bf16.xpose.msra.mxu1 %v3674_v55  ;;  %v3753_v55 = vld [vmem:[%s4658_s14 + $0x1a4] ss:$8 sps:$4 sm:$0xff]  }
 0x111   : > { %873 = vmatprep.subr.bf16.mxu1 %v3676_v57  ;;  %1482 = vmatpush1.bf16.xpose.msra.mxu0 %v3702_v58  ;;  %v3828_v57 = vld [vmem:[%s4666_s8 + $0x124] ss:$16 sps:$4 sm:$0xff]   ;;  %v3751_v58 = vld [vmem:[%s4658_s14 + $0x1a0] ss:$8 sps:$4 sm:$0xff]  }
 0x112   : > { %1483 = vmatprep.subr.bf16.mxu0 %v3706_v60  ;;  %v3826_v60 = vld [vmem:[%s4666_s8 + $0x120] ss:$16 sps:$4 sm:$0xff]  }
 0x118   : > { %874 = vmatpush1.bf16.xpose.msra.mxu1 %v3680_v59  ;;  %v3759_v59 = vld [vmem:[%s4658_s14 + $0x1b4] ss:$8 sps:$4 sm:$0xff]  }
 0x119   : > { %875 = vmatprep.subr.bf16.mxu1 %v3682_v61  ;;  %1484 = vmatpush1.bf16.xpose.msra.mxu0 %v3708_v62  ;;  %v3834_v61 = vld [vmem:[%s4666_s8 + $0x144] ss:$16 sps:$4 sm:$0xff]   ;;  %v3757_v62 = vld [vmem:[%s4658_s14 + $0x1b0] ss:$8 sps:$4 sm:$0xff]  }
 0x11a   : > { %1485 = vmatprep.subr.bf16.mxu0 %v3712_v0  ;;  %v3832_v0 = vld [vmem:[%s4666_s8 + $0x140] ss:$16 sps:$4 sm:$0xff]  }
 0x120   : > { %876 = vmatpush1.bf16.xpose.msra.mxu1 %v3686_v63  ;;  %v3762_v63 = vld [vmem:[%s4658_s14 + $0x1c4] ss:$8 sps:$4 sm:$0xff]  }
 0x121   : > { %958 = vmatprep.subr.bf16.mxu1 %v3693_v1  ;;  %1486 = vmatpush1.bf16.xpose.msra.mxu0 %v3714_v3  ;;  %v3840_v1 = vld [vmem:[%s4666_s8 + $0x164] ss:$16 sps:$4 sm:$0xff]   ;;  %v3760_v3 = vld [vmem:[%s4658_s14 + $0x1c0] ss:$8 sps:$4 sm:$0xff]  }
 0x122   : > { %2641 = vmatprep.subr.bf16.mxu0 %v3774_v7  ;;  %v3846_v7 = vld [vmem:[%s4666_s8 + $0x184] ss:$16 sps:$4 sm:$0xff]  }
 0x127   : > { %878 = vmatmul.mubr.bf16.vlgmr.msra.gmra.mrb[0].mxu1 %v4741_v2 }
 0x128   : > { %959 = vmatpush1.bf16.xpose.msra.mxu1 %v3691_v4  ;;  %887 = vmatprep.mubr.bf16.mxu1 %v4745_v5  ;;  %v3765_v4 = vld [vmem:[%s4658_s14 + $0x1d4] ss:$8 sps:$4 sm:$0xff]  }
 0x129   : > { %960 = vmatprep.subr.bf16.mxu1 %v3699_v6  ;;  %1488 = vmatmul.mubr.bf16.vlgmr.msra.gmra.mrb[0].mxu0 %v4741_v2  ;;  %v3838_v6 = vld [vmem:[%s4666_s8 + $0x160] ss:$16 sps:$4 sm:$0xff]  }
 0x12a   : > { %1497 = vmatprep.mubr.bf16.mxu0 %v4745_v5  ;;  %2642 = vmatpush1.bf16.xpose.msra.mxu0 %v3772_v12  ;;  %v3844_v12 = vld [vmem:[%s4666_s8 + $0x180] ss:$16 sps:$4 sm:$0xff]  }
 0x12b   : > { %2643 = vmatprep.subr.bf16.mxu0 %v3780_v13  ;;  %v3852_v13 = vld [vmem:[%s4666_s8 + $0x1a4] ss:$16 sps:$4 sm:$0xff]  }
 0x12f   : > { %888 = vmatmul.mubr.bf16.gmra.mrb[4].mxu1 %v4751_v8 }
 0x130   : > { %961 = vmatpush1.bf16.xpose.msra.mxu1 %v3697_v9  ;;  %897 = vmatprep.mubr.bf16.mxu1 %v4754_v10  ;;  %v3763_v9 = vld [vmem:[%s4658_s14 + $0x1d0] ss:$8 sps:$4 sm:$0xff]  }
 0x131   : > { %962 = vmatprep.subr.bf16.mxu1 %v3705_v11  ;;  %1498 = vmatmul.mubr.bf16.gmra.mrb[4].mxu0 %v4751_v8  ;;  %v3768_v11 = vld [vmem:[%s4658_s14 + $0x1e4] ss:$8 sps:$4 sm:$0xff]  }
 0x132   : > { %1507 = vmatprep.mubr.bf16.mxu0 %v4754_v10  ;;  %2644 = vmatpush1.bf16.xpose.msra.mxu0 %v3778_v18  ;;  %v3850_v18 = vld [vmem:[%s4666_s8 + $0x1a0] ss:$16 sps:$4 sm:$0xff]  }
 0x133   : > { %2645 = vmatprep.subr.bf16.mxu0 %v3786_v19  ;;  %v3858_v19 = vld [vmem:[%s4666_s8 + $0x1c4] ss:$16 sps:$4 sm:$0xff]  }
 0x137   : > { %898 = vmatmul.mubr.bf16.gmra.mrb[8].mxu1 %v4763_v14 }
 0x138   : > { %963 = vmatpush1.bf16.xpose.msra.mxu1 %v3703_v15  ;;  %907 = vmatprep.mubr.bf16.mxu1 %v4766_v16  ;;  %v3766_v15 = vld [vmem:[%s4658_s14 + $0x1e0] ss:$8 sps:$4 sm:$0xff]  }
 0x139   : > { %964 = vmatprep.subr.bf16.mxu1 %v3711_v17  ;;  %1508 = vmatmul.mubr.bf16.gmra.mrb[8].mxu0 %v4763_v14  ;;  %v3771_v17 = vld [vmem:[%s4658_s14 + $0x1f4] ss:$8 sps:$4 sm:$0xff]  }
 0x13a   : > { %1517 = vmatprep.mubr.bf16.mxu0 %v4766_v16  ;;  %2646 = vmatpush1.bf16.xpose.msra.mxu0 %v3784_v25  ;;  %v3856_v25 = vld [vmem:[%s4666_s8 + $0x1c0] ss:$16 sps:$4 sm:$0xff]  }
 0x13b   : > { %2647 = vmatprep.subr.bf16.mxu0 %v3792_v26  ;;  %v3864_v26 = vld [vmem:[%s4666_s8 + $0x1e4] ss:$16 sps:$4 sm:$0xff]  }
 0x13f   : > { %908 = vmatmul.mubr.bf16.gmra.mrb[12].mxu1 %v4775_v20 }
 0x140   : > { %965 = vmatpush1.bf16.xpose.msra.mxu1 %v3709_v21  ;;  %917 = vmatprep.mubr.bf16.mxu1 %v4778_v23  ;;  %v3769_v21 = vld [vmem:[%s4658_s14 + $0x1f0] ss:$8 sps:$4 sm:$0xff]  }
 0x141   : > { %966 = vmatprep.subr.bf16.mxu1 %v3717_v24  ;;  %1518 = vmatmul.mubr.bf16.gmra.mrb[12].mxu0 %v4775_v20  ;;  %v3777_v24 = vld [vmem:[%s4664_s9 + $0x104] ss:$8 sps:$4 sm:$0xff]  }
 0x142   : > { %1527 = vmatprep.mubr.bf16.mxu0 %v4778_v23  ;;  %2648 = vmatpush1.bf16.xpose.msra.mxu0 %v3790_v31  ;;  %v3862_v31 = vld [vmem:[%s4666_s8 + $0x1e0] ss:$16 sps:$4 sm:$0xff]  }
 0x143   : > { %2649 = vmatprep.subr.bf16.mxu0 %v3798_v32  ;;  %v3781_v32 = vld [vmem:[%s4664_s9 + $0x110] ss:$8 sps:$4 sm:$0xff]  }
 0x147   : > { %918 = vmatmul.mubr.bf16.gmra.mrb[16].mxu1 %v4787_v27 }
 0x148   : > { %967 = vmatpush1.bf16.xpose.msra.mxu1 %v3715_v28  ;;  %927 = vmatprep.mubr.bf16.mxu1 %v4790_v29  ;;  %v3775_v28 = vld [vmem:[%s4664_s9 + $0x100] ss:$8 sps:$4 sm:$0xff]  }
 0x149   : > { %968 = vmatprep.subr.bf16.mxu1 %v3723_v30  ;;  %1528 = vmatmul.mubr.bf16.gmra.mrb[16].mxu0 %v4787_v27  ;;  %v3783_v30 = vld [vmem:[%s4664_s9 + $0x114] ss:$8 sps:$4 sm:$0xff]  }
 0x14a   : > { %1537 = vmatprep.mubr.bf16.mxu0 %v4790_v29  ;;  %2650 = vmatpush1.bf16.xpose.msra.mxu0 %v3796_v37  ;;  %v3795_v37 = vld [vmem:[%s4664_s9 + $0x134] ss:$8 sps:$4 sm:$0xff]  }
 0x14b   : > { %2651 = vmatprep.subr.bf16.mxu0 %v3804_v38  ;;  %v3793_v38 = vld [vmem:[%s4664_s9 + $0x130] ss:$8 sps:$4 sm:$0xff]  }
 0x14f   : > { %928 = vmatmul.mubr.bf16.gmra.mrb[20].mxu1 %v4799_v33 }
 0x150   : > { %969 = vmatpush1.bf16.xpose.msra.mxu1 %v3721_v34  ;;  %937 = vmatprep.mubr.bf16.mxu1 %v4802_v35  ;;  %v3789_v34 = vld [vmem:[%s4664_s9 + $0x124] ss:$8 sps:$4 sm:$0xff]  }
 0x151   : > { %970 = vmatprep.subr.bf16.mxu1 %v3729_v36  ;;  %1538 = vmatmul.mubr.bf16.gmra.mrb[20].mxu0 %v4799_v33  ;;  %v3787_v36 = vld [vmem:[%s4664_s9 + $0x120] ss:$8 sps:$4 sm:$0xff]  }
 0x152   : > { %1547 = vmatprep.mubr.bf16.mxu0 %v4802_v35  ;;  %2652 = vmatpush1.bf16.xpose.msra.mxu0 %v3802_v43  ;;  %v3807_v43 = vld [vmem:[%s4664_s9 + $0x154] ss:$8 sps:$4 sm:$0xff]  }
 0x153   : > { %2653 = vmatprep.subr.bf16.mxu0 %v3810_v44  ;;  %v3837_v44 = vld [vmem:[%s4664_s9 + $0x1a4] ss:$8 sps:$4 sm:$0xff]  }
 0x157   : > { %938 = vmatmul.mubr.bf16.gmra.mrb[24].mxu1 %v4811_v39 }
 0x158   : > { %971 = vmatpush1.bf16.xpose.msra.mxu1 %v3727_v40  ;;  %947 = vmatprep.mubr.bf16.mxu1 %v4814_v41  ;;  %v3801_v40 = vld [vmem:[%s4664_s9 + $0x144] ss:$8 sps:$4 sm:$0xff]  }
 0x159   : > { %972 = vmatprep.subr.bf16.mxu1 %v3735_v42  ;;  %1548 = vmatmul.mubr.bf16.gmra.mrb[24].mxu0 %v4811_v39  ;;  %v3799_v42 = vld [vmem:[%s4664_s9 + $0x140] ss:$8 sps:$4 sm:$0xff]  }
 0x15a   : > { %1557 = vmatprep.mubr.bf16.mxu0 %v4814_v41  ;;  %2654 = vmatpush1.bf16.xpose.msra.mxu0 %v3808_v48 }
 0x15b   : > { %2655 = vmatprep.subr.bf16.mxu0 %v3816_v49 }
 0x15f   : > { %948 = vmatmul.mubr.bf16.gmra.mrb[28].mxu1 %v4823_v45 }
 0x160   : > { %973 = vmatpush1.bf16.xpose.msra.mxu1 %v3733_v46  ;;  %990 = vmatprep.mubr.bf16.mxu1 %v4694_v22  ;;  %v3843_v46 = vld [vmem:[%s4664_s9 + $0x1b4] ss:$8 sps:$4 sm:$0xff]  }
 0x161   : > { %974 = vmatprep.subr.bf16.mxu1 %v3741_v47  ;;  %1558 = vmatmul.mubr.bf16.gmra.mrb[28].mxu0 %v4823_v45 }
 0x162   : > { %2656 = vmatpush1.bf16.xpose.msra.mxu0 %v3814_v52 }
 0x163   : > { %2657 = vmatprep.subr.bf16.mxu0 %v3822_v53 }
 0x168   : > { %975 = vmatpush1.bf16.xpose.msra.mxu1 %v3739_v50  ;;  %v3841_v50 = vld [vmem:[%s4664_s9 + $0x1b0] ss:$8 sps:$4 sm:$0xff]  }
 0x169   : > { %976 = vmatprep.subr.bf16.mxu1 %v3747_v51 }
 0x16a   : > { %2658 = vmatpush1.bf16.xpose.msra.mxu0 %v3820_v56 }
 0x16b   : > { %2659 = vmatprep.subr.bf16.mxu0 %v3828_v57 }
 0x170   : > { %977 = vmatpush1.bf16.xpose.msra.mxu1 %v3745_v54  ;;  %v3849_v54 = vld [vmem:[%s4664_s9 + $0x1c4] ss:$8 sps:$4 sm:$0xff]  }
 0x171   : > { %978 = vmatprep.subr.bf16.mxu1 %v3753_v55 }
 0x172   : > { %2660 = vmatpush1.bf16.xpose.msra.mxu0 %v3826_v60 }
 0x173   : > { %2661 = vmatprep.subr.bf16.mxu0 %v3834_v61 }
 0x178   : > { %979 = vmatpush1.bf16.xpose.msra.mxu1 %v3751_v58 }
 0x179   : > { %980 = vmatprep.subr.bf16.mxu1 %v3759_v59 }
 0x17a   : > { %2662 = vmatpush1.bf16.xpose.msra.mxu0 %v3832_v0 }
 0x17b   : > { %2663 = vmatprep.subr.bf16.mxu0 %v3840_v1 }
 0x180   : > { %981 = vmatpush1.bf16.xpose.msra.mxu1 %v3757_v62 }
 0x181   : > { %982 = vmatprep.subr.bf16.mxu1 %v3762_v63  ;;  %v3870_v63 = vld [vmem:[%s4666_s8 + $0xc] ss:$16 sps:$4 sm:$0xff]  }
 0x182   : > { %2664 = vmatpush1.bf16.xpose.msra.mxu0 %v3838_v6 }
 0x183   : > { %2665 = vmatprep.subr.bf16.mxu0 %v3846_v7 }
 0x188   : > { %983 = vmatpush1.bf16.xpose.msra.mxu1 %v3760_v3 }
 0x189   : > { %984 = vmatprep.subr.bf16.mxu1 %v3765_v4 }
 0x18a   : > { %2666 = vmatpush1.bf16.xpose.msra.mxu0 %v3844_v12 }
 0x18b   : > { %2667 = vmatprep.subr.bf16.mxu0 %v3852_v13 }
 0x190   : > { %985 = vmatpush1.bf16.xpose.msra.mxu1 %v3763_v9  ;;  %v3847_v9 = vld [vmem:[%s4664_s9 + $0x1c0] ss:$8 sps:$4 sm:$0xff]  }
 0x191   : > { %986 = vmatprep.subr.bf16.mxu1 %v3768_v11 }
 0x192   : > { %2668 = vmatpush1.bf16.xpose.msra.mxu0 %v3850_v18 }
 0x193   : > { %2669 = vmatprep.subr.bf16.mxu0 %v3858_v19 }
 0x198   : > { %987 = vmatpush1.bf16.xpose.msra.mxu1 %v3766_v15  ;;  %v3855_v15 = vld [vmem:[%s4664_s9 + $0x1d4] ss:$8 sps:$4 sm:$0xff]  }
 0x199   : > { %988 = vmatprep.subr.bf16.mxu1 %v3771_v17 }
 0x19a   : > { %2670 = vmatpush1.bf16.xpose.msra.mxu0 %v3856_v25 }
 0x19b   : > { %2671 = vmatprep.subr.bf16.mxu0 %v3864_v26 }
 0x1a0   : > { %989 = vmatpush1.bf16.xpose.msra.mxu1 %v3769_v21 }
 0x1a1   : > { %1568 = vmatprep.subr.bf16.mxu1 %v3777_v24 }
 0x1a2   : > { %2672 = vmatpush1.bf16.xpose.msra.mxu0 %v3862_v31 }
 0x1a3   : > { %2754 = vmatprep.subr.bf16.mxu0 %v3870_v63 }
 0x1a7   : > { %991 = vmatmul.mubr.bf16.vlgmr.msra.gmra.mrb[32].mxu1 %v4741_v2 }
 0x1a8   : > { %1569 = vmatpush1.bf16.xpose.msra.mxu1 %v3775_v28  ;;  %1000 = vmatprep.mubr.bf16.mxu1 %v4745_v5 }
 0x1a9   : > { %1570 = vmatprep.subr.bf16.mxu1 %v3783_v30 }
 0x1af   : > { %1001 = vmatmul.mubr.bf16.gmra.mrb[36].mxu1 %v4751_v8 }
 0x1b0   : > { %1571 = vmatpush1.bf16.xpose.msra.mxu1 %v3781_v32  ;;  %1010 = vmatprep.mubr.bf16.mxu1 %v4754_v10 }
 0x1b1   : > { %1572 = vmatprep.subr.bf16.mxu1 %v3789_v34 }
 0x1b7   : > { %1011 = vmatmul.mubr.bf16.gmra.mrb[40].mxu1 %v4763_v14  ;;  %v3805_v14 = vld [vmem:[%s4664_s9 + $0x150] ss:$8 sps:$4 sm:$0xff]  }
 0x1b8   : > { %1573 = vmatpush1.bf16.xpose.msra.mxu1 %v3787_v36  ;;  %1020 = vmatprep.mubr.bf16.mxu1 %v4766_v16  ;;  %v3813_v16 = vld [vmem:[%s4664_s9 + $0x164] ss:$8 sps:$4 sm:$0xff]  }
 0x1b9   : > { %1574 = vmatprep.subr.bf16.mxu1 %v3795_v37 }
 0x1bf   : > { %1021 = vmatmul.mubr.bf16.gmra.mrb[44].mxu1 %v4775_v20  ;;  %v3811_v20 = vld [vmem:[%s4664_s9 + $0x160] ss:$8 sps:$4 sm:$0xff]  }
 0x1c0   : > { %1575 = vmatpush1.bf16.xpose.msra.mxu1 %v3793_v38  ;;  %1030 = vmatprep.mubr.bf16.mxu1 %v4778_v23  ;;  %v3819_v23 = vld [vmem:[%s4664_s9 + $0x174] ss:$8 sps:$4 sm:$0xff]  }
 0x1c1   : > { %1576 = vmatprep.subr.bf16.mxu1 %v3801_v40 }
 0x1c7   : > { %1031 = vmatmul.mubr.bf16.gmra.mrb[48].mxu1 %v4787_v27  ;;  %v3817_v27 = vld [vmem:[%s4664_s9 + $0x170] ss:$8 sps:$4 sm:$0xff]  }
 0x1c8   : > { %1577 = vmatpush1.bf16.xpose.msra.mxu1 %v3799_v42  ;;  %1040 = vmatprep.mubr.bf16.mxu1 %v4790_v29  ;;  %v3825_v29 = vld [vmem:[%s4664_s9 + $0x184] ss:$8 sps:$4 sm:$0xff]  }
 0x1c9   : > { %1578 = vmatprep.subr.bf16.mxu1 %v3807_v43 }
 0x1cf   : > { %1041 = vmatmul.mubr.bf16.gmra.mrb[52].mxu1 %v4799_v33  ;;  %v3823_v33 = vld [vmem:[%s4664_s9 + $0x180] ss:$8 sps:$4 sm:$0xff]  }
 0x1d0   : > { %1579 = vmatpush1.bf16.xpose.msra.mxu1 %v3805_v14  ;;  %1050 = vmatprep.mubr.bf16.mxu1 %v4802_v35  ;;  %v3831_v35 = vld [vmem:[%s4664_s9 + $0x194] ss:$8 sps:$4 sm:$0xff]  }
 0x1d1   : > { %1580 = vmatprep.subr.bf16.mxu1 %v3813_v16 }
 0x1d7   : > { %1051 = vmatmul.mubr.bf16.gmra.mrb[56].mxu1 %v4811_v39  ;;  %v3829_v39 = vld [vmem:[%s4664_s9 + $0x190] ss:$8 sps:$4 sm:$0xff]  }
 0x1d8   : > { %1581 = vmatpush1.bf16.xpose.msra.mxu1 %v3811_v20  ;;  %1060 = vmatprep.mubr.bf16.mxu1 %v4814_v41  ;;  %v3835_v41 = vld [vmem:[%s4664_s9 + $0x1a0] ss:$8 sps:$4 sm:$0xff]   ;;  %v3853_v20 = vld [vmem:[%s4664_s9 + $0x1d0] ss:$8 sps:$4 sm:$0xff]  }
 0x1d9   : > { %1582 = vmatprep.subr.bf16.mxu1 %v3819_v23 }
 0x1df   : > { %1061 = vmatmul.mubr.bf16.gmra.mrb[60].mxu1 %v4823_v45 }
 0x1e0   : > { %1583 = vmatpush1.bf16.xpose.msra.mxu1 %v3817_v27  ;;  %1600 = vmatprep.mubr.bf16.mxu1 %v4694_v22 }
 0x1e1   : > { %1584 = vmatprep.subr.bf16.mxu1 %v3825_v29 }
 0x1e8   : > { %1585 = vmatpush1.bf16.xpose.msra.mxu1 %v3823_v33 }
 0x1e9   : > { %1586 = vmatprep.subr.bf16.mxu1 %v3831_v35 }
 0x1f0   : > { %1587 = vmatpush1.bf16.xpose.msra.mxu1 %v3829_v39  ;;  %v3861_v39 = vld [vmem:[%s4664_s9 + $0x1e4] ss:$8 sps:$4 sm:$0xff]  }
 0x1f1   : > { %1588 = vmatprep.subr.bf16.mxu1 %v3837_v44 }
 0x1f8   : > { %1589 = vmatpush1.bf16.xpose.msra.mxu1 %v3835_v41 }
 0x1f9   : > { %1590 = vmatprep.subr.bf16.mxu1 %v3843_v46 }
 0x1fa   : > { %v4905_v47 = vpop.f32.mrb[0].mxu1 }
 0x1fb   : > { %v1681_v45 = vsub.f32 0.0, %v4905_v47  ;;  %v4908_v22 = vpop.f32.mrb[1].mxu1 }
 0x1fc   : > { %v1682_v48 = vsub.f32 0.0, %v4908_v22  ;;  %v4911_v49 = vpop.f32.mrb[2].mxu1  ;;  %v4919_v62 = vpop.f32.mrb[0].mxu0 }
 0x1fd   : > { %v1745_v51 = vmin.f32 %v1681_v45, 60.0  ;;  %v1685_v52 = vsub.f32 0.0, %v4911_v49  ;;  %v4915_v53 = vpop.f32.mrb[3].mxu1  ;;  %v4922_v1 = vpop.f32.mrb[1].mxu0 }
 0x1fe   : > { %v1746_v55 = vmin.f32 %v1682_v48, 60.0  ;;  %v1686_v56 = vsub.f32 0.0, %v4915_v53  ;;  %v4926_v4 = vpop.f32.mrb[2].mxu0 }
 0x1ff   : > { %v1809_v57 = vmul.f32 1.442695, %v1745_v51  ;;  %v1749_v58 = vmin.f32 %v1685_v52, 60.0  ;;  %v4932_v11 = vpop.f32.mrb[3].mxu0 }
 0x200   : > { %v1811_v59 = vmul.f32 1.442695, %v1746_v55  ;;  %v1750_v60 = vmin.f32 %v1686_v56, 60.0  ;;  %1591 = vmatpush1.bf16.xpose.msra.mxu1 %v3841_v50 }
 0x201   : > { %3916 = vpow2.f32 %v1809_v57  ;;  %v1817_v61 = vmul.f32 1.442695, %v1749_v58  ;;  %1592 = vmatprep.subr.bf16.mxu1 %v3849_v54 }
 0x202   : > { %3918 = vpow2.f32 %v1811_v59  ;;  %v1819_v0 = vmul.f32 1.442695, %v1750_v60  ;;  %v4924_v3 = vpop.f32.mrb[4].mxu1 }
 0x203   : > { %3920 = vpow2.f32 %v1817_v61  ;;  %v1689_v6 = vsub.f32 0.0, %v4924_v3  ;;  %v4929_v7 = vpop.f32.mrb[5].mxu1 }
 0x204   : > { %3922 = vpow2.f32 %v1819_v0  ;;  %v1690_v12 = vsub.f32 0.0, %v4929_v7  ;;  %v4935_v13 = vpop.f32.mrb[6].mxu1  ;;  %v4942_v32 = vpop.f32.mrb[4].mxu0 }
 0x205   : > { %v1753_v17 = vmin.f32 %v1689_v6, 60.0  ;;  %v1693_v18 = vsub.f32 0.0, %v4935_v13  ;;  %v4939_v19 = vpop.f32.mrb[7].mxu1  ;;  %v4946_v37 = vpop.f32.mrb[5].mxu0 }
 0x206   : > { %v1754_v21 = vmin.f32 %v1690_v12, 60.0  ;;  %v1694_v24 = vsub.f32 0.0, %v4939_v19  ;;  %v4951_v43 = vpop.f32.mrb[6].mxu0 }
 0x207   : > { %v1825_v25 = vmul.f32 1.442695, %v1753_v17  ;;  %v1757_v26 = vmin.f32 %v1693_v18, 60.0  ;;  %v4957_v29 = vpop.f32.mrb[7].mxu0  ;;  %v3859_v17 = vld [vmem:[%s4664_s9 + $0x1e0] ss:$8 sps:$4 sm:$0xff]  }
 0x208   : > { %1593 = vmatpush1.bf16.xpose.msra.mxu1 %v3847_v9  ;;  %v1827_v28 = vmul.f32 1.442695, %v1754_v21  ;;  %v1758_v30 = vmin.f32 %v1694_v24, 60.0 }
 0x209   : > { %1594 = vmatprep.subr.bf16.mxu1 %v3855_v15  ;;  %3924 = vpow2.f32 %v1825_v25  ;;  %v1833_v31 = vmul.f32 1.442695, %v1757_v26 }
 0x20a   : > { %3926 = vpow2.f32 %v1827_v28  ;;  %v1835_v34 = vmul.f32 1.442695, %v1758_v30  ;;  %v4944_v36 = vpop.f32.mrb[8].mxu1  ;;  %v3867_v28 = vld [vmem:[%s4664_s9 + $0x1f4] ss:$8 sps:$4 sm:$0xff]  }
 0x20b   : > { %v3917_v38 = vpop.eup %3916  ;;  %3928 = vpow2.f32 %v1833_v31  ;;  %v1697_v40 = vsub.f32 0.0, %v4944_v36  ;;  %v4949_v42 = vpop.f32.mrb[9].mxu1 }
 0x20c   : > { %v3919_v14 = vpop.eup %3918  ;;  %v1937_v16 = vadd.f32 1.0, %v3917_v38  ;;  %3930 = vpow2.f32 %v1835_v34  ;;  %v1698_v23 = vsub.f32 0.0, %v4949_v42  ;;  %v4955_v27 = vpop.f32.mrb[10].mxu1 }
 0x20d   : > { %v3921_v33 = vpop.eup %3920  ;;  %v1938_v35 = vadd.f32 1.0, %v3919_v14  ;;  %v1761_v44 = vmin.f32 %v1697_v40, 60.0  ;;  %v1701_v41 = vsub.f32 0.0, %v4955_v27  ;;  %v4961_v46 = vpop.f32.mrb[11].mxu1 }
 0x20e   : > { %v3923_v45 = vpop.eup %3922  ;;  %3932 = vrcp.f32 %v1937_v16  ;;  %v1941_v48 = vadd.f32 1.0, %v3921_v33  ;;  %v1762_v50 = vmin.f32 %v1698_v23, 60.0  ;;  %v1702_v51 = vsub.f32 0.0, %v4961_v46  ;;  %v4964_v59 = vpop.f32.mrb[8].mxu0 }
 0x20f   : > { %3934 = vrcp.f32 %v1938_v35  ;;  %v1942_v52 = vadd.f32 1.0, %v3923_v45  ;;  %v1841_v54 = vmul.f32 1.442695, %v1761_v44  ;;  %v1765_v55 = vmin.f32 %v1701_v41, 60.0  ;;  %v4968_v63 = vpop.f32.mrb[9].mxu0 }
 0x210   : > { %3936 = vrcp.f32 %v1941_v48  ;;  %1595 = vmatpush1.bf16.xpose.msra.mxu1 %v3853_v20  ;;  %v1843_v56 = vmul.f32 1.442695, %v1762_v50  ;;  %v1766_v57 = vmin.f32 %v1702_v51, 60.0  ;;  %v4973_v12 = vpop.f32.mrb[10].mxu0 }
 0x211   : > { %3938 = vrcp.f32 %v1942_v52  ;;  %1596 = vmatprep.subr.bf16.mxu1 %v3861_v39  ;;  %v1849_v58 = vmul.f32 1.442695, %v1765_v55  ;;  %v4979_v25 = vpop.f32.mrb[11].mxu0 }
 0x212   : > { %3940 = vpow2.f32 %v1841_v54  ;;  %v1851_v60 = vmul.f32 1.442695, %v1766_v57  ;;  %v4966_v61 = vpop.f32.mrb[12].mxu1 }
 0x213   : > { %v3925_v0 = vpop.eup %3924  ;;  %3942 = vpow2.f32 %v1843_v56  ;;  %v1705_v6 = vsub.f32 0.0, %v4966_v61  ;;  %v4971_v9 = vpop.f32.mrb[13].mxu1 }
 0x214   : > { %v3927_v15 = vpop.eup %3926  ;;  %v1945_v18 = vadd.f32 1.0, %v3925_v0  ;;  %3944 = vpow2.f32 %v1849_v58  ;;  %v1706_v21 = vsub.f32 0.0, %v4971_v9  ;;  %v4977_v24 = vpop.f32.mrb[14].mxu1 }
 0x215   : > { %v3929_v26 = vpop.eup %3928  ;;  %v1946_v30 = vadd.f32 1.0, %v3927_v15  ;;  %3946 = vpow2.f32 %v1851_v60  ;;  %v1769_v31 = vmin.f32 %v1705_v6, 60.0  ;;  %v1709_v34 = vsub.f32 0.0, %v4977_v24  ;;  %v4983_v38 = vpop.f32.mrb[15].mxu1 }
 0x216   : > { %v3931_v40 = vpop.eup %3930  ;;  %3948 = vrcp.f32 %v1945_v18  ;;  %v1949_v14 = vadd.f32 1.0, %v3929_v26  ;;  %v1770_v16 = vmin.f32 %v1706_v21, 60.0  ;;  %v1710_v20 = vsub.f32 0.0, %v4983_v38  ;;  %v4987_v51 = vpop.f32.mrb[12].mxu0  ;;  %v3865_v21 = vld [vmem:[%s4664_s9 + $0x1f0] ss:$8 sps:$4 sm:$0xff]  }
 0x217   : > { %3950 = vrcp.f32 %v1946_v30  ;;  %v1950_v23 = vadd.f32 1.0, %v3931_v40  ;;  %v1857_v33 = vmul.f32 1.442695, %v1769_v31  ;;  %v1773_v35 = vmin.f32 %v1709_v34, 60.0  ;;  %v4992_v57 = vpop.f32.mrb[13].mxu0 }
 0x218   : > { %v3933_v39 = vpop.eup %3932  ;;  %1597 = vmatpush1.bf16.xpose.msra.mxu1 %v3859_v17  ;;  %3952 = vrcp.f32 %v1949_v14  ;;  %v1859_v44 = vmul.f32 1.442695, %v1770_v16  ;;  %v1774_v41 = vmin.f32 %v1710_v20, 60.0  ;;  %v4999_v15 = vpop.f32.mrb[14].mxu0 }
 0x219   : > { %v3935_v45 = vpop.eup %3934  ;;  %v2065_v48 = vmul.f32 %v3933_v39, %v4905_v47  ;;  %1598 = vmatprep.subr.bf16.mxu1 %v3867_v28  ;;  %3954 = vrcp.f32 %v1950_v23  ;;  %v1865_v50 = vmul.f32 1.442695, %v1773_v35 }
 0x21a   : > { %v3937_v52 = vpop.eup %3936  ;;  %v2066_v54 = vmul.f32 %v3935_v45, %v4908_v22  ;;  %3956 = vpow2.f32 %v1857_v33  ;;  %v1867_v55 = vmul.f32 1.442695, %v1774_v41  ;;  %v4990_v56 = vpop.f32.mrb[16].mxu1 }
 0x21b   : > { %v3939_v58 = vpop.eup %3938  ;;  %v2069_v60 = vmul.f32 %v3937_v52, %v4911_v49  ;;  %v2129_v47 = vmul.f32 %v2065_v48, %v4919_v62  ;;  %3958 = vpow2.f32 %v1859_v44  ;;  %v1713_v0 = vsub.f32 0.0, %v4990_v56  ;;  %v4997_v6 = vpop.f32.mrb[17].mxu1  ;;  %v3868_v48 = vld [vmem:[%s4666_s8 + $0x8] ss:$16 sps:$4 sm:$0xff]  }
 0x21c   : > { %v3941_v17 = vpop.eup %3940  ;;  %v2070_v22 = vmul.f32 %v3939_v58, %v4915_v53  ;;  %v2130_v18 = vmul.f32 %v2066_v54, %v4922_v1  ;;  %3960 = vpow2.f32 %v1865_v50  ;;  %v1714_v26 = vsub.f32 0.0, %v4997_v6  ;;  %v5005_v28 = vpop.f32.mrb[18].mxu1  ;;  %v3873_v58 = vld [vmem:[%s4666_s8 + $0x2c] ss:$16 sps:$4 sm:$0xff]  }
 0x21d   : > { %v5007_v49 = vpop.f32.mrb[15].mxu0  ;;  %v3943_v62 = vpop.eup %3942  ;;  %v2133_v30 = vmul.f32 %v2069_v60, %v4926_v4  ;;  %v1953_v31 = vadd.f32 1.0, %v3941_v17  ;;  %3962 = vpow2.f32 %v1867_v55  ;;  %v1777_v34 = vmin.f32 %v1713_v0, 60.0 }
 0x21e   : > { %v5010_v40 = vpop.f32.mrb[19].mxu1  ;;  %v3945_v14 = vpop.eup %3944  ;;  %v2134_v53 = vmul.f32 %v2070_v22, %v4932_v11  ;;  %v1954_v1 = vadd.f32 1.0, %v3943_v62  ;;  %v1778_v16 = vmin.f32 %v1714_v26, 60.0  ;;  %v1717_v20 = vsub.f32 0.0, %v5005_v28 }
 0x21f   : > { %v3947_v23 = vpop.eup %3946  ;;  %v2193_v33 = vpack.c.bf16 %v2133_v30, %v2129_v47  ;;  %3964 = vrcp.f32 %v1953_v31  ;;  %v1957_v35 = vadd.f32 1.0, %v3945_v14  ;;  %v1873_v39 = vmul.f32 1.442695, %v1777_v34  ;;  %v5017_v55 = vpop.f32.mrb[16].mxu0 }
 0x220   : > { %v3949_v4 = vpop.eup %3948  ;;  %v2194_v44 = vpack.c.bf16 %v2134_v53, %v2130_v18  ;;  %1599 = vmatpush1.bf16.xpose.msra.mxu1 %v3865_v21  ;;  %3966 = vrcp.f32 %v1954_v1  ;;  %v1958_v41 = vadd.f32 1.0, %v3947_v23  ;;  %v1875_v45 = vmul.f32 1.442695, %v1778_v16  ;;  %v5023_v17 = vpop.f32.mrb[17].mxu0 }
 0x221   : > { %v3951_v50 = vpop.eup %3950  ;;  %v2073_v11 = vmul.f32 %v3949_v4, %v4924_v3  ;;  %3968 = vrcp.f32 %v1957_v35  ;;  %v1781_v52 = vmin.f32 %v1717_v20, 60.0  ;;  %v1718_v54 = vsub.f32 0.0, %v5010_v40  ;;  %v5028_v62 = vpop.f32.mrb[18].mxu0 }
 0x222   : > { %v3953_v60 = vpop.eup %3952  ;;  %v2074_v47 = vmul.f32 %v3951_v50, %v4929_v7  ;;  %2673 = vmatprep.mubr.bf16.mxu0 %v2194_v44  ;;  %3970 = vrcp.f32 %v1958_v41  ;;  %v5021_v0 = vpop.f32.mrb[20].mxu1 }
 0x223   : > { %v3955_v22 = vpop.eup %3954  ;;  %v2077_v18 = vmul.f32 %v3953_v60, %v4935_v13  ;;  %2674 = vmatmul.mubr.bf16.vlgmr.msra.gmra.mrb[32].mxu0 %v2193_v33  ;;  %3972 = vpow2.f32 %v1873_v39  ;;  %v1881_v3 = vmul.f32 1.442695, %v1781_v52  ;;  %v1782_v21 = vmin.f32 %v1718_v54, 60.0  ;;  %v5026_v26 = vpop.f32.mrb[21].mxu1  ;;  %v3871_v52 = vld [vmem:[%s4666_s8 + $0x28] ss:$16 sps:$4 sm:$0xff]  }
 0x224   : > { %v3957_v30 = vpop.eup %3956  ;;  %v2078_v7 = vmul.f32 %v3955_v22, %v4939_v19  ;;  %3974 = vpow2.f32 %v1875_v45  ;;  %v1721_v31 = vsub.f32 0.0, %v5021_v0  ;;  %v5033_v34 = vmul.f32 %v2073_v11, %v4942_v32  ;;  %v5035_v14 = vpop.f32.mrb[22].mxu1  ;;  %2755 = vmatpush1.bf16.xpose.msra.mxu0 %v3868_v48 }
 0x225   : > { %v5037_v13 = vpop.f32.mrb[19].mxu0  ;;  %v3959_v53 = vpop.eup %3958  ;;  %v1961_v1 = vadd.f32 1.0, %v3957_v30  ;;  %3976 = vpow2.f32 %v1881_v3  ;;  %v1883_v16 = vmul.f32 1.442695, %v1782_v21  ;;  %v1722_v20 = vsub.f32 0.0, %v5026_v26  ;;  %2756 = vmatprep.subr.bf16.mxu0 %v3873_v58 }
 0x226   : > { %v5040_v23 = vpop.f32.mrb[23].mxu1  ;;  %v3961_v19 = vpop.eup %3960  ;;  %v1962_v33 = vadd.f32 1.0, %v3959_v53  ;;  %v1785_v35 = vmin.f32 %v1721_v31, 60.0  ;;  %v2138_v32 = vmul.f32 %v2074_v47, %v4946_v37  ;;  %v1725_v39 = vsub.f32 0.0, %v5035_v14  ;;  %v3876_v47 = vld [vmem:[%s4666_s8 + $0x4c] ss:$16 sps:$4 sm:$0xff]  }
 0x227   : > { %v3963_v4 = vpop.eup %3962  ;;  %1601 = vmatmul.mubr.bf16.vlgmr.msra.gmra.mrb[64].mxu1 %v4741_v2  ;;  %3978 = vrcp.f32 %v1961_v1  ;;  %v1965_v44 = vadd.f32 1.0, %v3961_v19  ;;  %v1786_v41 = vmin.f32 %v1722_v20, 60.0  ;;  %v2141_v45 = vmul.f32 %v2077_v18, %v4951_v43  ;;  %v5050_v60 = vpop.f32.mrb[20].mxu0 }
 0x228   : > { %1610 = vmatprep.mubr.bf16.mxu1 %v4745_v5  ;;  %3980 = vrcp.f32 %v1962_v33  ;;  %v1966_v48 = vadd.f32 1.0, %v3963_v4  ;;  %v1889_v50 = vmul.f32 1.442695, %v1785_v35  ;;  %v1789_v11 = vmin.f32 %v1725_v39, 60.0  ;;  %v5057_v21 = vpop.f32.mrb[21].mxu0 }
 0x229   : > { %v3965_v54 = vpop.eup %3964  ;;  %3982 = vrcp.f32 %v1965_v44  ;;  %v1891_v37 = vmul.f32 1.442695, %v1786_v41  ;;  %v2197_v58 = vpack.c.bf16 %v2141_v45, %v5033_v34  ;;  %v1726_v2 = vsub.f32 0.0, %v5040_v23  ;;  %v5063_v20 = vpop.f32.mrb[22].mxu0 }
 0x22a   : > { %v3967_v22 = vpop.eup %3966  ;;  %v2081_v43 = vmul.f32 %v3965_v54, %v4944_v36  ;;  %3984 = vrcp.f32 %v1966_v48  ;;  %v1897_v5 = vmul.f32 1.442695, %v1789_v11  ;;  %v2142_v18 = vmul.f32 %v2078_v7, %v4957_v29  ;;  %v5055_v3 = vpop.f32.mrb[24].mxu1 }
 0x22b   : > { %v3969_v30 = vpop.eup %3968  ;;  %v2082_v31 = vmul.f32 %v3967_v22, %v4949_v42  ;;  %3986 = vpow2.f32 %v1883_v16  ;;  %v1790_v34 = vmin.f32 %v1726_v2, 60.0  ;;  %v1729_v53 = vsub.f32 0.0, %v5055_v3  ;;  %v5061_v1 = vpop.f32.mrb[25].mxu1 }
 0x22c   : > { %v3971_v36 = vpop.eup %3970  ;;  %v2085_v19 = vmul.f32 %v3969_v30, %v4955_v27  ;;  %3988 = vpow2.f32 %v1889_v50  ;;  %v2198_v29 = vpack.c.bf16 %v2142_v18, %v2138_v32  ;;  %v5067_v7 = vmul.f32 %v2081_v43, %v4964_v59  ;;  %v5069_v33 = vpop.f32.mrb[26].mxu1  ;;  %2757 = vmatpush1.bf16.xpose.msra.mxu0 %v3871_v52 }
 0x22d   : > { %v5071_v35 = vpop.f32.mrb[23].mxu0  ;;  %v3973_v42 = vpop.eup %3972  ;;  %v2086_v16 = vmul.f32 %v3971_v36, %v4961_v46  ;;  %3990 = vpow2.f32 %v1891_v37  ;;  %v1899_v39 = vmul.f32 1.442695, %v1790_v34  ;;  %v1793_v4 = vmin.f32 %v1729_v53, 60.0  ;;  %2758 = vmatprep.subr.bf16.mxu0 %v3876_v47  ;;  %v3874_v37 = vld [vmem:[%s4666_s8 + $0x48] ss:$16 sps:$4 sm:$0xff]  }
 0x22e   : > { %v5074_v44 = vpop.f32.mrb[27].mxu1  ;;  %v3975_v27 = vpop.eup %3974  ;;  %v1969_v41 = vadd.f32 1.0, %v3973_v42  ;;  %3992 = vpow2.f32 %v1897_v5  ;;  %2683 = vmatprep.mubr.bf16.mxu0 %v2198_v29  ;;  %v1730_v59 = vsub.f32 0.0, %v5061_v1  ;;  %v2146_v32 = vmul.f32 %v2082_v31, %v4968_v63 }
 0x22f   : > { %v3977_v45 = vpop.eup %3976  ;;  %1611 = vmatmul.mubr.bf16.gmra.mrb[68].mxu1 %v4751_v8  ;;  %v1970_v48 = vadd.f32 1.0, %v3975_v27  ;;  %3994 = vpow2.f32 %v1899_v39  ;;  %v1905_v46 = vmul.f32 1.442695, %v1793_v4  ;;  %2684 = vmatmul.mubr.bf16.gmra.mrb[36].mxu0 %v2197_v58  ;;  %v1733_v50 = vsub.f32 0.0, %v5069_v33  ;;  %v5085_v22 = vpop.f32.mrb[24].mxu0 }
 0x230   : > { %1620 = vmatprep.mubr.bf16.mxu1 %v4754_v10  ;;  %3996 = vrcp.f32 %v1969_v41  ;;  %v1973_v11 = vadd.f32 1.0, %v3977_v45  ;;  %v1794_v52 = vmin.f32 %v1730_v59, 60.0  ;;  %v2149_v54 = vmul.f32 %v2085_v19, %v4973_v12  ;;  %v3879_v58 = vld [vmem:[%s4666_s8 + $0x6c] ss:$16 sps:$4 sm:$0xff]   ;;  %v5092_v12 = vpop.f32.mrb[25].mxu0 }
 0x231   : > { %v3979_v2 = vpop.eup %3978  ;;  %3998 = vrcp.f32 %v1970_v48  ;;  %v1797_v63 = vmin.f32 %v1733_v50, 60.0  ;;  %v1734_v8 = vsub.f32 0.0, %v5074_v44  ;;  %v2150_v47 = vmul.f32 %v2086_v16, %v4979_v25  ;;  %v5097_v19 = vpop.f32.mrb[26].mxu0 }
 0x232   : > { %v3981_v43 = vpop.eup %3980  ;;  %v2089_v5 = vmul.f32 %v3979_v2, %v4966_v61  ;;  %4000 = vrcp.f32 %v1973_v11  ;;  %v1907_v10 = vmul.f32 1.442695, %v1794_v52  ;;  %v2201_v18 = vpack.c.bf16 %v2149_v54, %v5067_v7  ;;  %v5090_v30 = vpop.f32.mrb[28].mxu1  ;;  %v4172_v11 = vld [vmem:[#allocation3 + $0x20] ss:$8 sps:$4 sm:$0xff]  }
 0x233   : > { %v3983_v31 = vpop.eup %3982  ;;  %v2090_v34 = vmul.f32 %v3981_v43, %v4971_v9  ;;  %4002 = vpow2.f32 %v1905_v46  ;;  %v1913_v53 = vmul.f32 1.442695, %v1797_v63  ;;  %v1798_v25 = vmin.f32 %v1734_v8, 60.0  ;;  %v5095_v36 = vpop.f32.mrb[29].mxu1 }
 0x234   : > { %v3985_v29 = vpop.eup %3984  ;;  %v2093_v61 = vmul.f32 %v3983_v31, %v4977_v24  ;;  %4004 = vpow2.f32 %v1907_v10  ;;  %v2202_v42 = vpack.c.bf16 %v2150_v47, %v2146_v32  ;;  %v1737_v7 = vsub.f32 0.0, %v5090_v30  ;;  %v5101_v16 = vpop.f32.mrb[30].mxu1  ;;  %2759 = vmatpush1.bf16.xpose.msra.mxu0 %v3874_v37  ;;  %v4173_v37 = vld [vmem:[#allocation3 + $0x34] ss:$8 sps:$4 sm:$0xff]  }
 0x235   : > { %v5103_v39 = vpop.f32.mrb[27].mxu0  ;;  %v3987_v9 = vpop.eup %3986  ;;  %v2094_v4 = vmul.f32 %v3985_v29, %v4983_v38  ;;  %4006 = vpow2.f32 %v1913_v53  ;;  %v1915_v27 = vmul.f32 1.442695, %v1798_v25  ;;  %v5107_v41 = vmul.f32 %v2089_v5, %v4987_v51  ;;  %2760 = vmatprep.subr.bf16.mxu0 %v3879_v58 }
 0x236   : > { %v5109_v59 = vpop.f32.mrb[31].mxu1  ;;  %v3989_v24 = vpop.eup %3988  ;;  %v1974_v32 = vadd.f32 1.0, %v3987_v9  ;;  %v1801_v45 = vmin.f32 %v1737_v7, 60.0  ;;  %2693 = vmatprep.mubr.bf16.mxu0 %v2202_v42  ;;  %v1738_v48 = vsub.f32 0.0, %v5095_v36  ;;  %v2154_v46 = vmul.f32 %v2090_v34, %v4992_v57  ;;  %v3877_v57 = vld [vmem:[%s4666_s8 + $0x68] ss:$16 sps:$4 sm:$0xff]  }
 0x237   : > { %v3991_v50 = vpop.eup %3990  ;;  %1621 = vmatmul.mubr.bf16.gmra.mrb[72].mxu1 %v4172_v11  ;;  %v1977_v38 = vadd.f32 1.0, %v3989_v24  ;;  %4008 = vpow2.f32 %v1915_v27  ;;  %2694 = vmatmul.mubr.bf16.gmra.mrb[40].mxu0 %v2201_v18  ;;  %v1741_v51 = vsub.f32 0.0, %v5101_v16  ;;  %v2157_v52 = vmul.f32 %v2093_v61, %v4999_v15  ;;  %v5117_v10 = vpop.f32.mrb[28].mxu0  ;;  %v3882_v18 = vld [vmem:[%s4666_s8 + $0x8c] ss:$16 sps:$4 sm:$0xff]  }
 0x238   : > { %v3993_v54 = vpop.eup %3992  ;;  %4010 = vrcp.f32 %v1974_v32  ;;  %1630 = vmatprep.mubr.bf16.mxu1 %v4173_v37  ;;  %v1978_v2 = vadd.f32 1.0, %v3991_v50  ;;  %v1921_v63 = vmul.f32 1.442695, %v1801_v45  ;;  %v1802_v8 = vmin.f32 %v1738_v48, 60.0  ;;  %v5121_v25 = vpop.f32.mrb[29].mxu0 }
 0x239   : > { %v3995_v47 = vpop.eup %3994  ;;  %4012 = vrcp.f32 %v1977_v38  ;;  %v1981_v58 = vadd.f32 1.0, %v3993_v54  ;;  %v1805_v43 = vmin.f32 %v1741_v51, 60.0  ;;  %v2205_v5 = vpack.c.bf16 %v2157_v52, %v5107_v41  ;;  %v5125_v9 = vpop.f32.mrb[30].mxu0  ;;  %v4174_v38 = vld [vmem:[#allocation3 + $0x30] ss:$8 sps:$4 sm:$0xff]  }
 0x23a   : > { %v3997_v31 = vpop.eup %3996  ;;  %4014 = vrcp.f32 %v1978_v2  ;;  %v1982_v15 = vadd.f32 1.0, %v3995_v47  ;;  %v1923_v34 = vmul.f32 1.442695, %v1802_v8  ;;  %v1742_v53 = vsub.f32 0.0, %v5109_v59  ;;  %v5128_v32 = vpop.f32.mrb[31].mxu0 }
 0x23b   : > { %v3999_v29 = vpop.eup %3998  ;;  %v2097_v61 = vmul.f32 %v3997_v31, %v4990_v56  ;;  %4016 = vrcp.f32 %v1981_v58  ;;  %v1929_v42 = vmul.f32 1.442695, %v1805_v43  ;;  %v2158_v7 = vmul.f32 %v2094_v4, %v5007_v49  ;;  %v3880_v54 = vld [vmem:[%s4666_s8 + $0x88] ss:$16 sps:$4 sm:$0xff]  }
 0x23c   : > { %v4001_v27 = vpop.eup %4000  ;;  %v2098_v41 = vmul.f32 %v3999_v29, %v4997_v6  ;;  %4018 = vrcp.f32 %v1982_v15  ;;  %v1806_v24 = vmin.f32 %v1742_v53, 60.0  ;;  %2761 = vmatpush1.bf16.xpose.msra.mxu0 %v3877_v57  ;;  %v4176_v29 = vld [vmem:[#allocation3 + $0x40] ss:$8 sps:$4 sm:$0xff]  }
 0x23d   : > { %v4003_v45 = vpop.eup %4002  ;;  %v2101_v48 = vmul.f32 %v4001_v27, %v5005_v28  ;;  %4020 = vpow2.f32 %v1921_v63  ;;  %v2206_v50 = vpack.c.bf16 %v2158_v7, %v2154_v46  ;;  %v2161_v56 = vmul.f32 %v2097_v61, %v5017_v55  ;;  %2762 = vmatprep.subr.bf16.mxu0 %v3882_v18  ;;  %v4175_v46 = vld [vmem:[#allocation3 + $0x44] ss:$8 sps:$4 sm:$0xff]   ;;  %v3883_v27 = vld [vmem:[%s4666_s8 + $0xa8] ss:$16 sps:$4 sm:$0xff]  }
 0x23e   : > { %v4005_v11 = vpop.eup %4004  ;;  %v1985_v49 = vadd.f32 1.0, %v4003_v45  ;;  %4022 = vpow2.f32 %v1923_v34  ;;  %v2162_v4 = vmul.f32 %v2098_v41, %v5023_v17  ;;  %v1931_v52 = vmul.f32 1.442695, %v1806_v24  ;;  %v3885_v17 = vld [vmem:[%s4666_s8 + $0xac] ss:$16 sps:$4 sm:$0xff]  }
 0x23f   : > { %v4007_v6 = vpop.eup %4006  ;;  %1631 = vmatmul.mubr.bf16.gmra.mrb[76].mxu1 %v4174_v38  ;;  %v1986_v51 = vadd.f32 1.0, %v4005_v11  ;;  %4024 = vpow2.f32 %v1929_v42  ;;  %2703 = vmatprep.mubr.bf16.mxu0 %v2206_v50  ;;  %v2165_v28 = vmul.f32 %v2101_v48, %v5028_v62  ;;  %v3888_v24 = vld [vmem:[%s4666_s8 + $0xcc] ss:$16 sps:$4 sm:$0xff]  }
 0x240   : > { %1640 = vmatprep.mubr.bf16.mxu1 %v4175_v46  ;;  %4026 = vrcp.f32 %v1985_v49  ;;  %v1989_v55 = vadd.f32 1.0, %v4007_v6  ;;  %2704 = vmatmul.mubr.bf16.gmra.mrb[44].mxu0 %v2205_v5  ;;  %v3886_v46 = vld [vmem:[%s4666_s8 + $0xc8] ss:$16 sps:$4 sm:$0xff]  }
 0x241   : > { %v4009_v37 = vpop.eup %4008  ;;  %4028 = vrcp.f32 %v1986_v51  ;;  %v2209_v2 = vpack.c.bf16 %v2165_v28, %v2161_v56  ;;  %v4179_v28 = vld [vmem:[#allocation3 + $0x64] ss:$8 sps:$4 sm:$0xff]  }
 0x242   : > { %v4011_v63 = vpop.eup %4010  ;;  %4030 = vrcp.f32 %v1989_v55  ;;  %v1990_v8 = vadd.f32 1.0, %v4009_v37  ;;  %v3891_v55 = vld [vmem:[%s4666_s8 + $0xec] ss:$16 sps:$4 sm:$0xff]  }
 0x243   : > { %v4013_v57 = vpop.eup %4012  ;;  %v2102_v47 = vmul.f32 %v4011_v63, %v5010_v40  ;;  %4032 = vpow2.f32 %v1931_v52  ;;  %v4178_v52 = vld [vmem:[#allocation3 + $0x50] ss:$8 sps:$4 sm:$0xff]   ;;  %v4180_v63 = vld [vmem:[#allocation3 + $0x60] ss:$8 sps:$4 sm:$0xff]  }
 0x244   : > { %v4015_v58 = vpop.eup %4014  ;;  %v2105_v62 = vmul.f32 %v4013_v57, %v5021_v0  ;;  %4034 = vrcp.f32 %v1990_v8  ;;  %2763 = vmatpush1.bf16.xpose.msra.mxu0 %v3880_v54  ;;  %v4181_v8 = vld [vmem:[#allocation3 + $0x74] ss:$8 sps:$4 sm:$0xff]  }
 0x245   : > { %v4017_v43 = vpop.eup %4016  ;;  %v2106_v5 = vmul.f32 %v4015_v58, %v5026_v26  ;;  %v2166_v18 = vmul.f32 %v2102_v47, %v5037_v13  ;;  %2764 = vmatprep.subr.bf16.mxu0 %v3885_v17  ;;  %v4177_v26 = vld [vmem:[#allocation3 + $0x54] ss:$8 sps:$4 sm:$0xff]   ;;  %v3889_v47 = vld [vmem:[%s4666_s8 + $0xe8] ss:$16 sps:$4 sm:$0xff]  }
 0x246   : > { %v4019_v31 = vpop.eup %4018  ;;  %v2109_v15 = vmul.f32 %v4017_v43, %v5035_v14  ;;  %v2169_v34 = vmul.f32 %v2105_v62, %v5050_v60  ;;  %v3894_v58 = vld [vmem:[%s4666_s8 + $0x10c] ss:$16 sps:$4 sm:$0xff]   ;;  %v4182_v43 = vld [vmem:[#allocation3 + $0x70] ss:$8 sps:$4 sm:$0xff]  }
 0x247   : > { %v4021_v53 = vpop.eup %4020  ;;  %v2110_v40 = vmul.f32 %v4019_v31, %v5040_v23  ;;  %1641 = vmatmul.mubr.bf16.gmra.mrb[80].mxu1 %v4176_v29  ;;  %v2210_v0 = vpack.c.bf16 %v2166_v18, %v2162_v4  ;;  %v2170_v61 = vmul.f32 %v2106_v5, %v5057_v21  ;;  %v3897_v5 = vld [vmem:[%s4666_s8 + $0x12c] ss:$16 sps:$4 sm:$0xff]   ;;  %v3895_v18 = vld [vmem:[%s4666_s8 + $0x128] ss:$16 sps:$4 sm:$0xff]  }
 0x248   : > { %v4023_v42 = vpop.eup %4022  ;;  %1650 = vmatprep.mubr.bf16.mxu1 %v4177_v26  ;;  %v1993_v13 = vadd.f32 1.0, %v4021_v53  ;;  %v2173_v7 = vmul.f32 %v2109_v15, %v5063_v20  ;;  %v3903_v31 = vld [vmem:[%s4666_s8 + $0x16c] ss:$16 sps:$4 sm:$0xff]   ;;  %v3901_v15 = vld [vmem:[%s4666_s8 + $0x168] ss:$16 sps:$4 sm:$0xff]  }
 0x249   : > { %v4025_v41 = vpop.eup %4024  ;;  %v1994_v14 = vadd.f32 1.0, %v4023_v42  ;;  %2713 = vmatprep.mubr.bf16.mxu0 %v2210_v0  ;;  %v2174_v60 = vmul.f32 %v2110_v40, %v5071_v35  ;;  %v3909_v42 = vld [vmem:[%s4666_s8 + $0x1ac] ss:$16 sps:$4 sm:$0xff]  }
 0x24a   : > { %v4027_v45 = vpop.eup %4026  ;;  %4036 = vrcp.f32 %v1993_v13  ;;  %v1997_v23 = vadd.f32 1.0, %v4025_v41  ;;  %2714 = vmatmul.mubr.bf16.gmra.mrb[48].mxu0 %v2209_v2  ;;  %v2213_v48 = vpack.c.bf16 %v2173_v7, %v2169_v34  ;;  %v3906_v34 = vld [vmem:[%s4666_s8 + $0x18c] ss:$16 sps:$4 sm:$0xff]   ;;  %v3907_v41 = vld [vmem:[%s4666_s8 + $0x1a8] ss:$16 sps:$4 sm:$0xff]  }
 0x24b   : > { %v4029_v50 = vpop.eup %4028  ;;  %v2113_v21 = vmul.f32 %v4027_v45, %v5055_v3  ;;  %4038 = vrcp.f32 %v1994_v14  ;;  %v2214_v56 = vpack.c.bf16 %v2174_v60, %v2170_v61  ;;  %v3904_v61 = vld [vmem:[%s4666_s8 + $0x188] ss:$16 sps:$4 sm:$0xff]   ;;  %v3912_v14 = vld [vmem:[%s4666_s8 + $0x1cc] ss:$16 sps:$4 sm:$0xff]  }
 0x24c   : > { %v4031_v11 = vpop.eup %4030  ;;  %v2114_v20 = vmul.f32 %v4029_v50, %v5061_v1  ;;  %4040 = vrcp.f32 %v1997_v23  ;;  %2765 = vmatpush1.bf16.xpose.msra.mxu0 %v3883_v27  ;;  %v3915_v50 = vld [vmem:[%s4666_s8 + $0x1ec] ss:$16 sps:$4 sm:$0xff]  }
 0x24d   : > { %v4033_v49 = vpop.eup %4032  ;;  %v2117_v35 = vmul.f32 %v4031_v11, %v5069_v33  ;;  %v2177_v4 = vmul.f32 %v2113_v21, %v5085_v22  ;;  %2723 = vmatprep.mubr.bf16.mxu0 %v2214_v56  ;;  %2766 = vmatprep.subr.bf16.mxu0 %v3888_v24 }
 0x24e   : > { %v4035_v6 = vpop.eup %4034  ;;  %v1998_v38 = vadd.f32 1.0, %v4033_v49  ;;  %v2178_v3 = vmul.f32 %v2114_v20, %v5092_v12  ;;  %v3913_v49 = vld [vmem:[%s4666_s8 + $0x1e8] ss:$16 sps:$4 sm:$0xff]  }
 0x24f   : > { %v2118_v51 = vmul.f32 %v4035_v6, %v5074_v44  ;;  %1651 = vmatmul.mubr.bf16.gmra.mrb[84].mxu1 %v4178_v52  ;;  %v2181_v1 = vmul.f32 %v2117_v35, %v5097_v19 }
 0x250   : > { %4042 = vrcp.f32 %v1998_v38  ;;  %1660 = vmatprep.mubr.bf16.mxu1 %v4179_v28 }
 0x251   : > { %v2217_v33 = vpack.c.bf16 %v2181_v1, %v2177_v4  ;;  %v2182_v22 = vmul.f32 %v2118_v51, %v5103_v39 }
 0x252   : > { %2724 = vmatmul.mubr.bf16.gmra.mrb[52].mxu0 %v2213_v48  ;;  %v3910_v48 = vld [vmem:[%s4666_s8 + $0x1c8] ss:$16 sps:$4 sm:$0xff]  }
 0x253   : > { %v2218_v54 = vpack.c.bf16 %v2182_v22, %v2178_v3 }
 0x254   : > { %v4037_v37 = vpop.eup %4036  ;;  %2767 = vmatpush1.bf16.xpose.msra.mxu0 %v3886_v46 }
 0x255   : > { %v4039_v12 = vpop.eup %4038  ;;  %v2121_v44 = vmul.f32 %v4037_v37, %v5090_v30  ;;  %2733 = vmatprep.mubr.bf16.mxu0 %v2218_v54  ;;  %2768 = vmatprep.subr.bf16.mxu0 %v3891_v55 }
 0x256   : > { %v4041_v19 = vpop.eup %4040  ;;  %v2122_v2 = vmul.f32 %v4039_v12, %v5095_v36 }
 0x257   : > { %v2125_v17 = vmul.f32 %v4041_v19, %v5101_v16  ;;  %1661 = vmatmul.mubr.bf16.gmra.mrb[88].mxu1 %v4180_v63  ;;  %v2185_v39 = vmul.f32 %v2121_v44, %v5117_v10 }
 0x258   : > { %1670 = vmatprep.mubr.bf16.mxu1 %v4181_v8  ;;  %v2186_v57 = vmul.f32 %v2122_v2, %v5121_v25 }
 0x259   : > { %v2189_v30 = vmul.f32 %v2125_v17, %v5125_v9  ;;  %v3892_v9 = vld [vmem:[%s4666_s8 + $0x108] ss:$16 sps:$4 sm:$0xff]  }
 0x25a   : > { %v4043_v62 = vpop.eup %4042  ;;  %2734 = vmatmul.mubr.bf16.gmra.mrb[56].mxu0 %v2217_v33 }
 0x25b   : > { %v2126_v36 = vmul.f32 %v4043_v62, %v5109_v59  ;;  %v2221_v16 = vpack.c.bf16 %v2189_v30, %v2185_v39  ;;  %v3900_v59 = vld [vmem:[%s4666_s8 + $0x14c] ss:$16 sps:$4 sm:$0xff]  }
 0x25c   : > { %2769 = vmatpush1.bf16.xpose.msra.mxu0 %v3889_v47 }
 0x25d   : > { %v2190_v10 = vmul.f32 %v2126_v36, %v5128_v32  ;;  %2770 = vmatprep.subr.bf16.mxu0 %v3894_v58  ;;  %v3898_v32 = vld [vmem:[%s4666_s8 + $0x148] ss:$16 sps:$4 sm:$0xff]  }
 0x25f   : > { %1671 = vmatmul.mubr.bf16.gmra.mrb[92].mxu1 %v4182_v43  ;;  %v2222_v25 = vpack.c.bf16 %v2190_v10, %v2186_v57 }
 0x261   : > { %2743 = vmatprep.mubr.bf16.mxu0 %v2222_v25 }
 0x262   : > { %2744 = vmatmul.mubr.bf16.gmra.mrb[60].mxu0 %v2221_v16 }
 0x264   : > { %2771 = vmatpush1.bf16.xpose.msra.mxu0 %v3892_v9 }
 0x265   : > { %2772 = vmatprep.subr.bf16.mxu0 %v3897_v5 }
 0x26c   : > { %2773 = vmatpush1.bf16.xpose.msra.mxu0 %v3895_v18 }
 0x26d   : > { %2774 = vmatprep.subr.bf16.mxu0 %v3900_v59 }
 0x274   : > { %2775 = vmatpush1.bf16.xpose.msra.mxu0 %v3898_v32 }
 0x275   : > { %2776 = vmatprep.subr.bf16.mxu0 %v3903_v31 }
 0x27a   : > { %v5176_v53 = vpop.f32.mrb[32].mxu1 }
 0x27b   : > { %v5178_v40 = vpop.f32.mrb[33].mxu1  ;;  %v1683_v44 = vsub.f32 0.0, %v5176_v53 }
 0x27c   : > { %v5180_v29 = vpop.f32.mrb[34].mxu1  ;;  %2777 = vmatpush1.bf16.xpose.msra.mxu0 %v3901_v15  ;;  %v1684_v19 = vsub.f32 0.0, %v5178_v40 }
 0x27d   : > { %v5182_v0 = vpop.f32.mrb[35].mxu1  ;;  %2778 = vmatprep.subr.bf16.mxu0 %v3906_v34  ;;  %v1747_v2 = vmin.f32 %v1683_v44, 60.0  ;;  %v1687_v63 = vsub.f32 0.0, %v5180_v29 }
 0x27e   : > { %v1748_v17 = vmin.f32 %v1684_v19, 60.0  ;;  %v1688_v39 = vsub.f32 0.0, %v5182_v0 }
 0x27f   : > { %v1813_v8 = vmul.f32 1.442695, %v1747_v2  ;;  %v1751_v30 = vmin.f32 %v1687_v63, 60.0 }
 0x280   : > { %v1815_v47 = vmul.f32 1.442695, %v1748_v17  ;;  %v1752_v62 = vmin.f32 %v1688_v39, 60.0 }
 0x281   : > { %4044 = vpow2.f32 %v1813_v8  ;;  %v1821_v10 = vmul.f32 1.442695, %v1751_v30 }
 0x282   : > { %v5186_v26 = vpop.f32.mrb[36].mxu1  ;;  %4046 = vpow2.f32 %v1815_v47  ;;  %v1823_v9 = vmul.f32 1.442695, %v1752_v62 }
 0x283   : > { %v5188_v13 = vpop.f32.mrb[37].mxu1  ;;  %v1691_v57 = vsub.f32 0.0, %v5186_v26  ;;  %4048 = vpow2.f32 %v1821_v10 }
 0x284   : > { %v5190_v7 = vpop.f32.mrb[38].mxu1  ;;  %2779 = vmatpush1.bf16.xpose.msra.mxu0 %v3904_v61  ;;  %v1692_v58 = vsub.f32 0.0, %v5188_v13  ;;  %4050 = vpow2.f32 %v1823_v9 }
 0x285   : > { %v5192_v27 = vpop.f32.mrb[39].mxu1  ;;  %2780 = vmatprep.subr.bf16.mxu0 %v3909_v42  ;;  %v1755_v36 = vmin.f32 %v1691_v57, 60.0  ;;  %v1695_v16 = vsub.f32 0.0, %v5190_v7 }
 0x286   : > { %v1756_v43 = vmin.f32 %v1692_v58, 60.0  ;;  %v1696_v25 = vsub.f32 0.0, %v5192_v27 }
 0x287   : > { %v1829_v18 = vmul.f32 1.442695, %v1755_v36  ;;  %v1759_v59 = vmin.f32 %v1695_v16, 60.0 }
 0x288   : > { %v1831_v32 = vmul.f32 1.442695, %v1756_v43  ;;  %v1760_v31 = vmin.f32 %v1696_v25, 60.0 }
 0x289   : > { %4052 = vpow2.f32 %v1829_v18  ;;  %v1837_v61 = vmul.f32 1.442695, %v1759_v59 }
 0x28a   : > { %v5196_v60 = vpop.f32.mrb[40].mxu1  ;;  %4054 = vpow2.f32 %v1831_v32 }
 0x28b   : > { %v5198_v24 = vpop.f32.mrb[41].mxu1  ;;  %v1699_v5 = vsub.f32 0.0, %v5196_v60  ;;  %4056 = vpow2.f32 %v1837_v61 }
 0x28c   : > { %v5200_v45 = vpop.f32.mrb[42].mxu1  ;;  %2781 = vmatpush1.bf16.xpose.msra.mxu0 %v3907_v41  ;;  %v1700_v34 = vsub.f32 0.0, %v5198_v24 }
 0x28d   : > { %v5202_v23 = vpop.f32.mrb[43].mxu1  ;;  %2782 = vmatprep.subr.bf16.mxu0 %v3912_v14  ;;  %v1763_v15 = vmin.f32 %v1699_v5, 60.0  ;;  %v1703_v42 = vsub.f32 0.0, %v5200_v45  ;;  %v4045_v14 = vpop.eup %4044 }
 0x28e   : > { %v1704_v41 = vsub.f32 0.0, %v5202_v23  ;;  %v1764_v44 = vmin.f32 %v1700_v34, 60.0  ;;  %v1939_v17 = vadd.f32 1.0, %v4045_v14 }
 0x28f   : > { %v1767_v2 = vmin.f32 %v1703_v42, 60.0 }
 0x290   : > { %v1768_v63 = vmin.f32 %v1704_v41, 60.0  ;;  %v1847_v57 = vmul.f32 1.442695, %v1764_v44 }
 0x291   : > { %v1853_v58 = vmul.f32 1.442695, %v1767_v2 }
 0x292   : > { %v5206_v21 = vpop.f32.mrb[44].mxu1  ;;  %v1855_v16 = vmul.f32 1.442695, %v1768_v63 }
 0x293   : > { %v5208_v56 = vpop.f32.mrb[45].mxu1  ;;  %v1707_v19 = vsub.f32 0.0, %v5206_v21 }
 0x294   : > { %v5210_v11 = vpop.f32.mrb[46].mxu1  ;;  %2783 = vmatpush1.bf16.xpose.msra.mxu0 %v3910_v48  ;;  %v1839_v48 = vmul.f32 1.442695, %v1760_v31  ;;  %v1708_v30 = vsub.f32 0.0, %v5208_v56 }
 0x295   : > { %v5212_v20 = vpop.f32.mrb[47].mxu1  ;;  %2784 = vmatprep.subr.bf16.mxu0 %v3915_v50  ;;  %v4047_v50 = vpop.eup %4046  ;;  %v1771_v47 = vmin.f32 %v1707_v19, 60.0  ;;  %v1711_v62 = vsub.f32 0.0, %v5210_v11 }
 0x296   : > { %v1940_v39 = vadd.f32 1.0, %v4047_v50  ;;  %4058 = vpow2.f32 %v1839_v48  ;;  %v4049_v8 = vpop.eup %4048  ;;  %v1712_v25 = vsub.f32 0.0, %v5212_v20  ;;  %v1772_v18 = vmin.f32 %v1708_v30, 60.0 }
 0x297   : > { %v4051_v36 = vpop.eup %4050  ;;  %v1943_v43 = vadd.f32 1.0, %v4049_v8  ;;  %v1861_v5 = vmul.f32 1.442695, %v1771_v47  ;;  %v1775_v32 = vmin.f32 %v1711_v62, 60.0 }
 0x298   : > { %v4053_v10 = vpop.eup %4052  ;;  %v1944_v59 = vadd.f32 1.0, %v4051_v36  ;;  %v1776_v42 = vmin.f32 %v1712_v25, 60.0  ;;  %v1863_v14 = vmul.f32 1.442695, %v1772_v18 }
 0x299   : > { %v4055_v9 = vpop.eup %4054  ;;  %v1947_v31 = vadd.f32 1.0, %v4053_v10 }
 0x29a   : > { %v5215_v35 = vpop.f32.mrb[48].mxu1  ;;  %v4057_v34 = vpop.eup %4056  ;;  %v1948_v61 = vadd.f32 1.0, %v4055_v9 }
 0x29b   : > { %v5217_v4 = vpop.f32.mrb[49].mxu1  ;;  %v1951_v19 = vadd.f32 1.0, %v4057_v34 }
 0x29c   : > { %v5219_v6 = vpop.f32.mrb[50].mxu1  ;;  %2785 = vmatpush1.bf16.xpose.msra.mxu0 %v3913_v49  ;;  %v1845_v49 = vmul.f32 1.442695, %v1763_v15  ;;  %v1715_v15 = vsub.f32 0.0, %v5215_v35  ;;  %v1716_v41 = vsub.f32 0.0, %v5217_v4 }
 0x29d   : > { %v5221_v38 = vpop.f32.mrb[51].mxu1  ;;  %v1719_v48 = vsub.f32 0.0, %v5219_v6 }
 0x29e   : > { %4060 = vpow2.f32 %v1845_v49  ;;  %v1869_v49 = vmul.f32 1.442695, %v1775_v32  ;;  %v1779_v2 = vmin.f32 %v1715_v15, 60.0  ;;  %v1780_v63 = vmin.f32 %v1716_v41, 60.0 }
 0x29f   : > { %4062 = vrcp.f32 %v1939_v17  ;;  %v1871_v17 = vmul.f32 1.442695, %v1776_v42  ;;  %v1720_v47 = vsub.f32 0.0, %v5221_v38 }
 0x2a0   : > { %4064 = vrcp.f32 %v1940_v39  ;;  %v4059_v50 = vpop.eup %4058  ;;  %v1877_v36 = vmul.f32 1.442695, %v1779_v2 }
 0x2a1   : > { %4066 = vpow2.f32 %v1847_v57  ;;  %v1952_v8 = vadd.f32 1.0, %v4059_v50  ;;  %v1783_v57 = vmin.f32 %v1719_v48, 60.0  ;;  %v1784_v18 = vmin.f32 %v1720_v47, 60.0 }
 0x2a2   : > { %v5223_v3 = vpop.f32.mrb[52].mxu1  ;;  %4068 = vpow2.f32 %v1853_v58 }
 0x2a3   : > { %v5225_v51 = vpop.f32.mrb[53].mxu1  ;;  %4070 = vpow2.f32 %v1855_v16  ;;  %v1723_v16 = vsub.f32 0.0, %v5223_v3 }
 0x2a4   : > { %v5227_v52 = vpop.f32.mrb[54].mxu1  ;;  %4072 = vrcp.f32 %v1943_v43  ;;  %v1879_v43 = vmul.f32 1.442695, %v1780_v63  ;;  %v1724_v25 = vsub.f32 0.0, %v5225_v51 }
 0x2a5   : > { %v5229_v1 = vpop.f32.mrb[55].mxu1  ;;  %4074 = vpow2.f32 %v1861_v5  ;;  %v1885_v5 = vmul.f32 1.442695, %v1783_v57 }
 0x2a6   : > { %4076 = vrcp.f32 %v1944_v59  ;;  %v1727_v59 = vsub.f32 0.0, %v5227_v52  ;;  %v1728_v63 = vsub.f32 0.0, %v5229_v1 }
 0x2a7   : > { %4078 = vrcp.f32 %v1947_v31 }
 0x2a8   : > { %v4061_v44 = vpop.eup %4060  ;;  %4080 = vrcp.f32 %v1948_v61  ;;  %v1787_v61 = vmin.f32 %v1723_v16, 60.0 }
 0x2a9   : > { %v4063_v39 = vpop.eup %4062  ;;  %4082 = vpow2.f32 %v1863_v14  ;;  %v1955_v58 = vadd.f32 1.0, %v4061_v44  ;;  %v1788_v14 = vmin.f32 %v1724_v25, 60.0  ;;  %v1791_v44 = vmin.f32 %v1727_v59, 60.0 }
 0x2aa   : > { %v5231_v28 = vpop.f32.mrb[56].mxu1  ;;  %v4065_v30 = vpop.eup %4064  ;;  %4084 = vpow2.f32 %v1869_v49  ;;  %v2067_v50 = vmul.f32 %v4063_v39, %v5176_v53  ;;  %v1887_v49 = vmul.f32 1.442695, %v1784_v18 }
 0x2ab   : > { %v5233_v46 = vpop.f32.mrb[57].mxu1  ;;  %v4067_v62 = vpop.eup %4066  ;;  %4086 = vrcp.f32 %v1951_v19  ;;  %v2068_v2 = vmul.f32 %v4065_v30, %v5178_v40  ;;  %v1895_v39 = vmul.f32 1.442695, %v1788_v14  ;;  %v1901_v30 = vmul.f32 1.442695, %v1791_v44 }
 0x2ac   : > { %v5235_v33 = vpop.f32.mrb[58].mxu1  ;;  %v4069_v10 = vpop.eup %4068  ;;  %4088 = vpow2.f32 %v1871_v17  ;;  %v1956_v31 = vadd.f32 1.0, %v4067_v62 }
 0x2ad   : > { %v5237_v22 = vpop.f32.mrb[59].mxu1  ;;  %v4071_v9 = vpop.eup %4070  ;;  %4090 = vrcp.f32 %v1952_v8  ;;  %v1959_v34 = vadd.f32 1.0, %v4069_v10  ;;  %v1735_v44 = vsub.f32 0.0, %v5235_v33 }
 0x2ae   : > { %v4073_v32 = vpop.eup %4072  ;;  %4092 = vrcp.f32 %v1955_v58  ;;  %v1960_v41 = vadd.f32 1.0, %v4071_v9  ;;  %v1893_v58 = vmul.f32 1.442695, %v1787_v61 }
 0x2af   : > { %v4075_v15 = vpop.eup %4074  ;;  %4094 = vpow2.f32 %v1877_v36  ;;  %v2071_v47 = vmul.f32 %v4073_v32, %v5180_v29  ;;  %v1792_v29 = vmin.f32 %v1728_v63, 60.0 }
 0x2b0   : > { %v4077_v42 = vpop.eup %4076  ;;  %4096 = vpow2.f32 %v1879_v43  ;;  %v1963_v17 = vadd.f32 1.0, %v4075_v15  ;;  %v1731_v15 = vsub.f32 0.0, %v5231_v28 }
 0x2b1   : > { %v4079_v48 = vpop.eup %4078  ;;  %4098 = vpow2.f32 %v1885_v5  ;;  %v2072_v53 = vmul.f32 %v4077_v42, %v5182_v0  ;;  %v1732_v42 = vsub.f32 0.0, %v5233_v46  ;;  %v1903_v63 = vmul.f32 1.442695, %v1792_v29 }
 0x2b2   : > { %v5239_v55 = vpop.f32.mrb[60].mxu1  ;;  %v4081_v19 = vpop.eup %4080  ;;  %4100 = vrcp.f32 %v1956_v31  ;;  %v2075_v61 = vmul.f32 %v4079_v48, %v5186_v26 }
 0x2b3   : > { %v5241_v54 = vpop.f32.mrb[61].mxu1  ;;  %v4083_v57 = vpop.eup %4082  ;;  %4102 = vrcp.f32 %v1959_v34 }
 0x2b4   : > { %v5243_v37 = vpop.f32.mrb[62].mxu1  ;;  %v4085_v16 = vpop.eup %4084  ;;  %4104 = vrcp.f32 %v1960_v41  ;;  %v1964_v18 = vadd.f32 1.0, %v4083_v57 }
 0x2b5   : > { %v5245_v12 = vpop.f32.mrb[63].mxu1  ;;  %v4087_v40 = vpop.eup %4086  ;;  %4106 = vpow2.f32 %v1887_v49  ;;  %v1967_v31 = vadd.f32 1.0, %v4085_v16  ;;  %v1796_v16 = vmin.f32 %v1732_v42, 60.0 }
 0x2b6   : > { %v4089_v5 = vpop.eup %4088  ;;  %4108 = vrcp.f32 %v1963_v17  ;;  %v2079_v17 = vmul.f32 %v4087_v40, %v5190_v7 }
 0x2b7   : > { %v4091_v32 = vpop.eup %4090  ;;  %4110 = vpow2.f32 %v1893_v58  ;;  %v1968_v49 = vadd.f32 1.0, %v4089_v5 }
 0x2b8   : > { %v4093_v34 = vpop.eup %4092  ;;  %4112 = vpow2.f32 %v1895_v39  ;;  %v2080_v48 = vmul.f32 %v4091_v32, %v5192_v27 }
 0x2b9   : > { %v4095_v14 = vpop.eup %4094  ;;  %4114 = vpow2.f32 %v1901_v30 }
 0x2ba   : > { %4116 = vrcp.f32 %v1964_v18 }
 0x2bb   : > { %4118 = vrcp.f32 %v1967_v31 }
 0x2bc   : > { %4120 = vrcp.f32 %v1968_v49 }
 0x2bd   : > { %4122 = vpow2.f32 %v1903_v63 }
 0x2fa   : > { %v1602_v8 = vpop.f32.mrb[64].mxu1 }
 0x2fb   : > { %v2131_v62 = vmul.f32 %v2067_v50, %v1602_v8  ;;  %v1604_v36 = vpop.f32.mrb[65].mxu1  ;;  %v2076_v50 = vmul.f32 %v4081_v19, %v5188_v13  ;;  %v1736_v8 = vsub.f32 0.0, %v5237_v22 }
 0x2fc   : > { %v2132_v10 = vmul.f32 %v2068_v2, %v1604_v36  ;;  %v1606_v43 = vpop.f32.mrb[66].mxu1  ;;  %v4097_v2 = vpop.eup %4096  ;;  %v1971_v36 = vadd.f32 1.0, %v4095_v14  ;;  %v1743_v14 = vsub.f32 0.0, %v5243_v37 }
 0x2fd   : > { %v2135_v25 = vmul.f32 %v2071_v47, %v1606_v43  ;;  %v1608_v9 = vpop.f32.mrb[67].mxu1  ;;  %v4099_v26 = vpop.eup %4098  ;;  %v1795_v47 = vmin.f32 %v1731_v15, 60.0  ;;  %v1799_v43 = vmin.f32 %v1735_v44, 60.0  ;;  %v1911_v15 = vmul.f32 1.442695, %v1796_v16 }
 0x2fe   : > { %v2136_v59 = vmul.f32 %v2072_v53, %v1608_v9  ;;  %v4101_v19 = vpop.eup %4100  ;;  %v1975_v27 = vadd.f32 1.0, %v4099_v26  ;;  %v1800_v9 = vmin.f32 %v1736_v8, 60.0  ;;  %4124 = vrcp.f32 %v1971_v36 }
 0x2ff   : > { %v2195_v0 = vpack.c.bf16 %v2135_v25, %v2131_v62  ;;  %v2083_v62 = vmul.f32 %v4093_v34, %v5196_v60  ;;  %v4103_v39 = vpop.eup %4102  ;;  %v2084_v29 = vmul.f32 %v4101_v19, %v5198_v24  ;;  %v1739_v60 = vsub.f32 0.0, %v5239_v55 }
 0x300   : > { %v2196_v41 = vpack.c.bf16 %v2136_v59, %v2132_v10  ;;  %v1972_v10 = vadd.f32 1.0, %v4097_v2  ;;  %v4105_v25 = vpop.eup %4104  ;;  %v1909_v59 = vmul.f32 1.442695, %v1795_v47  ;;  %v2087_v42 = vmul.f32 %v4103_v39, %v5200_v45 }
 0x301   : > { %v4107_v18 = vpop.eup %4106  ;;  %v2088_v24 = vmul.f32 %v4105_v25, %v5202_v23  ;;  %v1919_v49 = vmul.f32 1.442695, %v1800_v9  ;;  %v1744_v44 = vsub.f32 0.0, %v5245_v12  ;;  %v1803_v8 = vmin.f32 %v1739_v60, 60.0 }
 0x302   : > { %v1612_v57 = vpop.f32.mrb[68].mxu1  ;;  %2786 = vmatprep.mubr.bf16.mxu0 %v2196_v41  ;;  %v4109_v31 = vpop.eup %4108  ;;  %4126 = vrcp.f32 %v1972_v10  ;;  %v1917_v41 = vmul.f32 1.442695, %v1799_v43  ;;  %v1976_v63 = vadd.f32 1.0, %v4107_v18  ;;  %v1807_v36 = vmin.f32 %v1743_v14, 60.0 }
 0x303   : > { %v2139_v58 = vmul.f32 %v2075_v61, %v1612_v57  ;;  %v1614_v13 = vpop.f32.mrb[69].mxu1  ;;  %2787 = vmatmul.mubr.bf16.vlgmr.msra.gmra.mrb[32].mxu0 %v2195_v0  ;;  %v1740_v0 = vsub.f32 0.0, %v5241_v54  ;;  %v4111_v61 = vpop.eup %4110  ;;  %4128 = vrcp.f32 %v1975_v27  ;;  %v1808_v39 = vmin.f32 %v1744_v44, 60.0 }
 0x304   : > { %v2140_v7 = vmul.f32 %v2076_v50, %v1614_v13  ;;  %v1616_v53 = vpop.f32.mrb[70].mxu1  ;;  %v4113_v50 = vpop.eup %4112  ;;  %4130 = vpow2.f32 %v1909_v59  ;;  %v2091_v9 = vmul.f32 %v4109_v31, %v5206_v21 }
 0x305   : > { %v2143_v40 = vmul.f32 %v2079_v17, %v1616_v53  ;;  %v1618_v30 = vpop.f32.mrb[71].mxu1  ;;  %v4115_v17 = vpop.eup %4114  ;;  %4132 = vpow2.f32 %v1911_v15  ;;  %v1804_v47 = vmin.f32 %v1740_v0, 60.0  ;;  %v1980_v19 = vadd.f32 1.0, %v4113_v50 }
 0x306   : > { %v2144_v5 = vmul.f32 %v2080_v48, %v1618_v30  ;;  %v4117_v45 = vpop.eup %4116  ;;  %v1979_v48 = vadd.f32 1.0, %v4111_v61  ;;  %4134 = vpow2.f32 %v1917_v41  ;;  %v1983_v53 = vadd.f32 1.0, %v4115_v17 }
 0x307   : > { %v2199_v32 = vpack.c.bf16 %v2143_v40, %v2139_v58  ;;  %v4119_v23 = vpop.eup %4118  ;;  %4136 = vpow2.f32 %v1919_v49  ;;  %v1927_v25 = vmul.f32 1.442695, %v1804_v47  ;;  %v1935_v59 = vmul.f32 1.442695, %v1808_v39 }
 0x308   : > { %v2200_v34 = vpack.c.bf16 %v2144_v5, %v2140_v7  ;;  %v4121_v43 = vpop.eup %4120  ;;  %4138 = vrcp.f32 %v1976_v63  ;;  %v1933_v5 = vmul.f32 1.442695, %v1807_v36  ;;  %v2095_v15 = vmul.f32 %v4119_v23, %v5210_v11 }
 0x309   : > { %v4123_v30 = vpop.eup %4122  ;;  %4140 = vrcp.f32 %v1979_v48  ;;  %v2096_v21 = vmul.f32 %v4121_v43, %v5212_v20 }
 0x30a   : > { %v1622_v2 = vpop.f32.mrb[72].mxu1  ;;  %2796 = vmatprep.mubr.bf16.mxu0 %v2200_v34  ;;  %4142 = vrcp.f32 %v1980_v19  ;;  %v4125_v18 = vpop.eup %4124  ;;  %v1984_v0 = vadd.f32 1.0, %v4123_v30 }
 0x30b   : > { %v2147_v57 = vmul.f32 %v2083_v62, %v1622_v2  ;;  %v1624_v26 = vpop.f32.mrb[73].mxu1  ;;  %2797 = vmatmul.mubr.bf16.gmra.mrb[36].mxu0 %v2199_v32  ;;  %v1925_v62 = vmul.f32 1.442695, %v1803_v8  ;;  %4144 = vrcp.f32 %v1983_v53 }
 0x30c   : > { %v2148_v58 = vmul.f32 %v2084_v29, %v1624_v26  ;;  %v1626_v13 = vpop.f32.mrb[74].mxu1  ;;  %v2092_v29 = vmul.f32 %v4117_v45, %v5208_v56  ;;  %v4127_v32 = vpop.eup %4126 }
 0x30d   : > { %v2151_v16 = vmul.f32 %v2087_v42, %v1626_v13  ;;  %v1628_v7 = vpop.f32.mrb[75].mxu1  ;;  %4146 = vpow2.f32 %v1925_v62  ;;  %v4129_v42 = vpop.eup %4128  ;;  %v2100_v45 = vmul.f32 %v4127_v32, %v5217_v4 }
 0x30e   : > { %v2152_v10 = vmul.f32 %v2088_v24, %v1628_v7  ;;  %4148 = vpow2.f32 %v1927_v25  ;;  %v4131_v14 = vpop.eup %4130  ;;  %v2103_v13 = vmul.f32 %v4129_v42, %v5219_v6 }
 0x30f   : > { %v2203_v40 = vpack.c.bf16 %v2151_v16, %v2147_v57  ;;  %4150 = vpow2.f32 %v1933_v5  ;;  %v4133_v24 = vpop.eup %4132  ;;  %v1987_v17 = vadd.f32 1.0, %v4131_v14  ;;  %v2099_v57 = vmul.f32 %v4125_v18, %v5215_v35 }
 0x310   : > { %v2204_v27 = vpack.c.bf16 %v2152_v10, %v2148_v58  ;;  %4152 = vpow2.f32 %v1935_v59  ;;  %v4135_v44 = vpop.eup %4134  ;;  %v1988_v20 = vadd.f32 1.0, %v4133_v24 }
 0x311   : > { %4154 = vrcp.f32 %v1984_v0  ;;  %v4137_v2 = vpop.eup %4136  ;;  %v1991_v48 = vadd.f32 1.0, %v4135_v44 }
 0x312   : > { %v1632_v60 = vpop.f32.mrb[76].mxu1  ;;  %2806 = vmatprep.mubr.bf16.mxu0 %v2204_v27  ;;  %v4139_v8 = vpop.eup %4138  ;;  %v1992_v23 = vadd.f32 1.0, %v4137_v2  ;;  %4156 = vrcp.f32 %v1987_v17 }
 0x313   : > { %v2155_v34 = vmul.f32 %v2091_v9, %v1632_v60  ;;  %v1634_v61 = vpop.f32.mrb[77].mxu1  ;;  %2807 = vmatmul.mubr.bf16.gmra.mrb[40].mxu0 %v2203_v40  ;;  %v4141_v26 = vpop.eup %4140  ;;  %v2104_v7 = vmul.f32 %v4139_v8, %v5221_v38  ;;  %4158 = vrcp.f32 %v1988_v20 }
 0x314   : > { %v2156_v31 = vmul.f32 %v2092_v29, %v1634_v61  ;;  %v1636_v41 = vpop.f32.mrb[78].mxu1  ;;  %v4143_v58 = vpop.eup %4142  ;;  %4160 = vrcp.f32 %v1991_v48  ;;  %v2107_v5 = vmul.f32 %v4141_v26, %v5223_v3 }
 0x315   : > { %v2159_v56 = vmul.f32 %v2095_v15, %v1636_v41  ;;  %v1638_v50 = vpop.f32.mrb[79].mxu1  ;;  %v4145_v16 = vpop.eup %4144  ;;  %4162 = vrcp.f32 %v1992_v23  ;;  %v2108_v18 = vmul.f32 %v4143_v58, %v5225_v51 }
 0x316   : > { %v2160_v49 = vmul.f32 %v2096_v21, %v1638_v50  ;;  %v2111_v60 = vmul.f32 %v4145_v16, %v5227_v52 }
 0x317   : > { %v2207_v11 = vpack.c.bf16 %v2159_v56, %v2155_v34  ;;  %v4147_v39 = vpop.eup %4146 }
 0x318   : > { %v2208_v63 = vpack.c.bf16 %v2160_v49, %v2156_v31  ;;  %v4149_v43 = vpop.eup %4148  ;;  %v1995_v25 = vadd.f32 1.0, %v4147_v39 }
 0x319   : > { %v4151_v40 = vpop.eup %4150  ;;  %v1996_v38 = vadd.f32 1.0, %v4149_v43 }
 0x31a   : > { %v1642_v47 = vpop.f32.mrb[80].mxu1  ;;  %2816 = vmatprep.mubr.bf16.mxu0 %v2208_v63  ;;  %v4153_v30 = vpop.eup %4152  ;;  %v1999_v29 = vadd.f32 1.0, %v4151_v40  ;;  %4164 = vrcp.f32 %v1995_v25  ;;  %v2227_v40 = vld [vmem:[#allocation2 + $0x10] sm:$0xff] }
 0x31b   : > { %v2163_v19 = vmul.f32 %v2099_v57, %v1642_v47  ;;  %v1644_v36 = vpop.f32.mrb[81].mxu1  ;;  %2817 = vmatmul.mubr.bf16.gmra.mrb[44].mxu0 %v2207_v11  ;;  %v4155_v9 = vpop.eup %4154  ;;  %v2000_v32 = vadd.f32 1.0, %v4153_v30  ;;  %4166 = vrcp.f32 %v1996_v38  ;;  %v2228_v30 = vld [vmem:[#allocation2 + $0x18] sm:$0xff]  ;;  %v2229_v38 = vld [vmem:[#allocation2 + $0x20] sm:$0xff] }
 0x31c   : > { %v2164_v53 = vmul.f32 %v2100_v45, %v1644_v36  ;;  %v1646_v35 = vpop.f32.mrb[82].mxu1  ;;  %v2112_v34 = vmul.f32 %v4155_v9, %v5229_v1  ;;  %v4157_v31 = vpop.eup %4156  ;;  %4168 = vrcp.f32 %v1999_v29 }
 0x31d   : > { %v2167_v10 = vmul.f32 %v2103_v13, %v1646_v35  ;;  %v1648_v4 = vpop.f32.mrb[83].mxu1  ;;  %v4159_v41 = vpop.eup %4158  ;;  %4170 = vrcp.f32 %v2000_v32  ;;  %v2115_v24 = vmul.f32 %v4157_v31, %v5231_v28  ;;  %v2234_v31 = vld [vmem:[#allocation2 + $0x48] sm:$0xff] }
 0x31e   : > { %v2168_v62 = vmul.f32 %v2104_v7, %v1648_v4  ;;  %v4161_v56 = vpop.eup %4160  ;;  %v2116_v49 = vmul.f32 %v4159_v41, %v5233_v46  ;;  %v2235_v41 = vld [vmem:[#allocation2 + $0x50] sm:$0xff] }
 0x31f   : > { %v2211_v6 = vpack.c.bf16 %v2167_v10, %v2163_v19  ;;  %v4163_v50 = vpop.eup %4162  ;;  %v2119_v44 = vmul.f32 %v4161_v56, %v5235_v33 }
 0x320   : > { %v2212_v27 = vpack.c.bf16 %v2168_v62, %v2164_v53  ;;  %v2120_v17 = vmul.f32 %v4163_v50, %v5237_v22 }
 0x322   : > { %v1652_v59 = vpop.f32.mrb[84].mxu1  ;;  %2826 = vmatprep.mubr.bf16.mxu0 %v2212_v27 }
 0x323   : > { %v2171_v15 = vmul.f32 %v2107_v5, %v1652_v59  ;;  %v1654_v0 = vpop.f32.mrb[85].mxu1  ;;  %2827 = vmatmul.mubr.bf16.gmra.mrb[48].mxu0 %v2211_v6  ;;  %v2231_v59 = vld [vmem:[#allocation2 + $0x30] sm:$0xff] }
 0x324   : > { %v2172_v61 = vmul.f32 %v2108_v18, %v1654_v0  ;;  %v1656_v42 = vpop.f32.mrb[86].mxu1  ;;  %v4165_v26 = vpop.eup %4164  ;;  %v2230_v18 = vld [vmem:[#allocation2 + $0x28] sm:$0xff] }
 0x325   : > { %v2175_v21 = vmul.f32 %v2111_v60, %v1656_v42  ;;  %v1658_v3 = vpop.f32.mrb[87].mxu1  ;;  %v4167_v48 = vpop.eup %4166  ;;  %v2123_v13 = vmul.f32 %v4165_v26, %v5239_v55  ;;  %v2225_v55 = vld [vmem:[#allocation2] sm:$0xff] }
 0x326   : > { %v2176_v51 = vmul.f32 %v2112_v34, %v1658_v3  ;;  %v4169_v28 = vpop.eup %4168  ;;  %v2124_v33 = vmul.f32 %v4167_v48, %v5241_v54  ;;  %v2226_v54 = vld [vmem:[#allocation2 + $0x8] sm:$0xff]  ;;  %v2233_v3 = vld [vmem:[#allocation2 + $0x40] sm:$0xff] }
 0x327   : > { %v2215_v14 = vpack.c.bf16 %v2175_v21, %v2171_v15  ;;  %v4171_v46 = vpop.eup %4170  ;;  %v2127_v19 = vmul.f32 %v4169_v28, %v5243_v37  ;;  %v2232_v15 = vld [vmem:[#allocation2 + $0x38] sm:$0xff] }
 0x328   : > { %v2216_v52 = vpack.c.bf16 %v2176_v51, %v2172_v61  ;;  %v2128_v16 = vmul.f32 %v4171_v46, %v5245_v12  ;;  %v2242_v46 = vld [vmem:[#allocation2 + $0x88] sm:$0xff] }
 0x32a   : > { %v1662_v1 = vpop.f32.mrb[88].mxu1  ;;  %2836 = vmatprep.mubr.bf16.mxu0 %v2216_v52  ;;  %v2236_v52 = vld [vmem:[#allocation2 + $0x58] sm:$0xff] }
 0x32b   : > { %v2179_v11 = vmul.f32 %v2115_v24, %v1662_v1  ;;  %v1664_v2 = vpop.f32.mrb[89].mxu1  ;;  %2837 = vmatmul.mubr.bf16.gmra.mrb[52].mxu0 %v2215_v14 }
 0x32c   : > { %v2180_v63 = vmul.f32 %v2116_v49, %v1664_v2  ;;  %v1666_v8 = vpop.f32.mrb[90].mxu1  ;;  %v2238_v2 = vld [vmem:[#allocation2 + $0x68] sm:$0xff] }
 0x32d   : > { %v2183_v57 = vmul.f32 %v2119_v44, %v1666_v8  ;;  %v1668_v20 = vpop.f32.mrb[91].mxu1 }
 0x32e   : > { %v2184_v45 = vmul.f32 %v2120_v17, %v1668_v20  ;;  %v2240_v20 = vld [vmem:[#allocation2 + $0x78] sm:$0xff] }
 0x32f   : > { %v2219_v47 = vpack.c.bf16 %v2183_v57, %v2179_v11  ;;  %v2237_v11 = vld [vmem:[#allocation2 + $0x60] sm:$0xff] }
 0x330   : > { %v2220_v58 = vpack.c.bf16 %v2184_v45, %v2180_v63  ;;  %v2239_v63 = vld [vmem:[#allocation2 + $0x70] sm:$0xff] }
 0x332   : > { %v1672_v23 = vpop.f32.mrb[92].mxu1  ;;  %2846 = vmatprep.mubr.bf16.mxu0 %v2220_v58  ;;  %v2241_v58 = vld [vmem:[#allocation2 + $0x80] sm:$0xff] }
 0x333   : > { %v2187_v22 = vmul.f32 %v2123_v13, %v1672_v23  ;;  %v1674_v36 = vpop.f32.mrb[93].mxu1  ;;  %2847 = vmatmul.mubr.bf16.gmra.mrb[56].mxu0 %v2219_v47 }
 0x334   : > { %v2188_v7 = vmul.f32 %v2124_v33, %v1674_v36  ;;  %v1676_v53 = vpop.f32.mrb[94].mxu1  ;;  %v2243_v33 = vld [vmem:[#allocation2 + $0x90] sm:$0xff] }
 0x335   : > { %v2191_v35 = vmul.f32 %v2127_v19, %v1676_v53  ;;  %v1678_v39 = vpop.f32.mrb[95].mxu1 }
 0x336   : > { %v2192_v10 = vmul.f32 %v2128_v16, %v1678_v39  ;;  %v2245_v39 = vld [vmem:[#allocation2 + $0xa0] sm:$0xff] }
 0x337   : > { %v2223_v4 = vpack.c.bf16 %v2191_v35, %v2187_v22  ;;  %v2244_v22 = vld [vmem:[#allocation2 + $0x98] sm:$0xff] }
 0x338   : > { %v2224_v43 = vpack.c.bf16 %v2192_v10, %v2188_v7  ;;  %v2246_v10 = vld [vmem:[#allocation2 + $0xa8] sm:$0xff] }
 0x33a   : > { %2856 = vmatprep.mubr.bf16.mxu0 %v2224_v43  ;;  %v2247_v43 = vld [vmem:[#allocation2 + $0xb0] sm:$0xff] }
 0x33b   : > { %2857 = vmatmul.mubr.bf16.gmra.mrb[60].mxu0 %v2223_v4 }
 0x3d6   : > { %v2788_v62 = vpop.f32.mrb[32].mxu0 }
 0x3d7   : > { %v2867_v6 = vadd.f32 %v2788_v62, %v2225_v55  ;;  %v2790_v37 = vpop.f32.mrb[33].mxu0  ;;  %v2248_v62 = vld [vmem:[#allocation2 + $0xb8] sm:$0xff] }
 0x3d8   : > { %v2868_v25 = vadd.f32 %v2790_v37, %v2226_v54  ;;  %v2792_v27 = vpop.f32.mrb[34].mxu0 }
 0x3d9   : > { %2899 = vst [vmem:[#allocation2] sm:$0xff] %v2867_v6  ;;  %v2869_v12 = vadd.f32 %v2792_v27, %v2227_v40  ;;  %v2794_v9 = vpop.f32.mrb[35].mxu0  ;;  %v2249_v27 = vld [vmem:[#allocation2 + $0xc0] sm:$0xff] }
 0x3da   : > { %2900 = vst [vmem:[#allocation2 + $0x8] sm:$0xff] %v2868_v25  ;;  %v2870_v5 = vadd.f32 %v2794_v9, %v2228_v30 }
 0x3db   : > { %2901 = vst [vmem:[#allocation2 + $0x10] sm:$0xff] %v2869_v12  ;;  %v2250_v12 = vld [vmem:[#allocation2 + $0xc8] sm:$0xff] }
 0x3dc   : > { %2902 = vst [vmem:[#allocation2 + $0x18] sm:$0xff] %v2870_v5  ;;  %v2251_v5 = vld [vmem:[#allocation2 + $0xd0] sm:$0xff] }
 0x3de   : > { %v2798_v29 = vpop.f32.mrb[36].mxu0 }
 0x3df   : > { %v2871_v60 = vadd.f32 %v2798_v29, %v2229_v38  ;;  %v2800_v32 = vpop.f32.mrb[37].mxu0  ;;  %v2252_v29 = vld [vmem:[#allocation2 + $0xd8] sm:$0xff] }
 0x3e0   : > { %v2872_v0 = vadd.f32 %v2800_v32, %v2230_v18  ;;  %v2802_v34 = vpop.f32.mrb[38].mxu0 }
 0x3e1   : > { %2903 = vst [vmem:[#allocation2 + $0x20] sm:$0xff] %v2871_v60  ;;  %v2873_v61 = vadd.f32 %v2802_v34, %v2231_v59  ;;  %v2804_v42 = vpop.f32.mrb[39].mxu0  ;;  %v2253_v34 = vld [vmem:[#allocation2 + $0xe0] sm:$0xff] }
 0x3e2   : > { %2904 = vst [vmem:[#allocation2 + $0x28] sm:$0xff] %v2872_v0  ;;  %v2874_v21 = vadd.f32 %v2804_v42, %v2232_v15 }
 0x3e3   : > { %2905 = vst [vmem:[#allocation2 + $0x30] sm:$0xff] %v2873_v61  ;;  %v2254_v61 = vld [vmem:[#allocation2 + $0xe8] sm:$0xff] }
 0x3e4   : > { %2906 = vst [vmem:[#allocation2 + $0x38] sm:$0xff] %v2874_v21  ;;  %v2255_v21 = vld [vmem:[#allocation2 + $0xf0] sm:$0xff] }
 0x3e6   : > { %v2808_v51 = vpop.f32.mrb[40].mxu0 }
 0x3e7   : > { %v2875_v14 = vadd.f32 %v2808_v51, %v2233_v3  ;;  %v2810_v56 = vpop.f32.mrb[41].mxu0  ;;  %v2256_v51 = vld [vmem:[#allocation2 + $0xf8] sm:$0xff] }
 0x3e8   : > { %v2876_v50 = vadd.f32 %v2810_v56, %v2234_v31  ;;  %v2812_v24 = vpop.f32.mrb[42].mxu0 }
 0x3e9   : > { %2907 = vst [vmem:[#allocation2 + $0x40] sm:$0xff] %v2875_v14  ;;  %v2877_v49 = vadd.f32 %v2812_v24, %v2235_v41  ;;  %v2814_v1 = vpop.f32.mrb[43].mxu0  ;;  %v2935_v24 = vld [vmem:[#allocation2] sm:$0xff] (!%p3439_p4) }
 0x3ea   : > { %2908 = vst [vmem:[#allocation2 + $0x48] sm:$0xff] %v2876_v50  ;;  %v2878_v44 = vadd.f32 %v2814_v1, %v2236_v52  ;;  %v2937_v1 = vld [vmem:[#allocation2 + $0x10] sm:$0xff] (!%p3439_p4) }
 0x3eb   : > { %2909 = vst [vmem:[#allocation2 + $0x50] sm:$0xff] %v2877_v49  ;;  %v2936_v49 = vld [vmem:[#allocation2 + $0x8] sm:$0xff] (!%p3439_p4) }
 0x3ec   : > { %2910 = vst [vmem:[#allocation2 + $0x58] sm:$0xff] %v2878_v44  ;;  %v3465_v44 = vpack.c.bf16 (!%p3439_p4), %v2936_v49, %v2935_v24 }
 0x3ee   : > { %v2818_v17 = vpop.f32.mrb[44].mxu0  ;;  %3063 = vst [vmem:[#allocation11] sm:$0xff] (!%p3439_p4), %v3465_v44 }
 0x3ef   : > { %v2879_v8 = vadd.f32 %v2818_v17, %v2237_v11  ;;  %v2820_v57 = vpop.f32.mrb[45].mxu0  ;;  %v2938_v11 = vld [vmem:[#allocation2 + $0x18] sm:$0xff] (!%p3439_p4)  ;;  %v2940_v17 = vld [vmem:[#allocation2 + $0x28] sm:$0xff] (!%p3439_p4) }
 0x3f0   : > { %v2880_v26 = vadd.f32 %v2820_v57, %v2238_v2  ;;  %v2822_v45 = vpop.f32.mrb[46].mxu0  ;;  %v2939_v2 = vld [vmem:[#allocation2 + $0x20] sm:$0xff] (!%p3439_p4)  ;;  %v2941_v57 = vld [vmem:[#allocation2 + $0x30] sm:$0xff] (!%p3439_p4) }
 0x3f1   : > { %2911 = vst [vmem:[#allocation2 + $0x60] sm:$0xff] %v2879_v8  ;;  %v2881_v48 = vadd.f32 %v2822_v45, %v2239_v63  ;;  %v2824_v47 = vpop.f32.mrb[47].mxu0  ;;  %v3466_v63 = vpack.c.bf16 (!%p3439_p4), %v2938_v11, %v2937_v1  ;;  %v3467_v8 = vpack.c.bf16 (!%p3439_p4), %v2940_v17, %v2939_v2 }
 0x3f2   : > { %2912 = vst [vmem:[#allocation2 + $0x68] sm:$0xff] %v2880_v26  ;;  %v2882_v28 = vadd.f32 %v2824_v47, %v2240_v20  ;;  %v2942_v20 = vld [vmem:[#allocation2 + $0x38] sm:$0xff] (!%p3439_p4)  ;;  %v2943_v26 = vld [vmem:[#allocation2 + $0x40] sm:$0xff] (!%p3439_p4)  ;;  %v2945_v47 = vld [vmem:[#allocation2 + $0x50] sm:$0xff] (!%p3439_p4) }
 0x3f3   : > { %2913 = vst [vmem:[#allocation2 + $0x70] sm:$0xff] %v2881_v48  ;;  %v3468_v45 = vpack.c.bf16 (!%p3439_p4), %v2942_v20, %v2941_v57  ;;  %v2944_v48 = vld [vmem:[#allocation2 + $0x48] sm:$0xff] (!%p3439_p4)  ;;  %3064 = vst [vmem:[#allocation11 + $0x8] sm:$0xff] (!%p3439_p4), %v3466_v63 }
 0x3f4   : > { %2914 = vst [vmem:[#allocation2 + $0x78] sm:$0xff] %v2882_v28  ;;  %v2946_v28 = vld [vmem:[#allocation2 + $0x58] sm:$0xff] (!%p3439_p4)  ;;  %3065 = vst [vmem:[#allocation11 + $0x10] sm:$0xff] (!%p3439_p4), %v3467_v8 }
 0x3f5   : > { %3066 = vst [vmem:[#allocation11 + $0x18] sm:$0xff] (!%p3439_p4), %v3468_v45 }
 0x3f6   : > { %v2828_v13 = vpop.f32.mrb[48].mxu0 }
 0x3f7   : > { %v2883_v23 = vadd.f32 %v2828_v13, %v2241_v58  ;;  %v2830_v19 = vpop.f32.mrb[49].mxu0  ;;  %v3469_v58 = vpack.c.bf16 (!%p3439_p4), %v2944_v48, %v2943_v26 }
 0x3f8   : > { %v2884_v36 = vadd.f32 %v2830_v19, %v2242_v46  ;;  %v2832_v16 = vpop.f32.mrb[50].mxu0  ;;  %v3470_v46 = vpack.c.bf16 (!%p3439_p4), %v2946_v28, %v2945_v47  ;;  %v2947_v13 = vld [vmem:[#allocation2 + $0x60] sm:$0xff] (!%p3439_p4) }
 0x3f9   : > { %2915 = vst [vmem:[#allocation2 + $0x80] sm:$0xff] %v2883_v23  ;;  %v2885_v7 = vadd.f32 %v2832_v16, %v2243_v33  ;;  %v2834_v53 = vpop.f32.mrb[51].mxu0  ;;  %v2948_v33 = vld [vmem:[#allocation2 + $0x68] sm:$0xff] (!%p3439_p4)  ;;  %3067 = vst [vmem:[#allocation11 + $0x20] sm:$0xff] (!%p3439_p4), %v3469_v58 }
 0x3fa   : > { %2916 = vst [vmem:[#allocation2 + $0x88] sm:$0xff] %v2884_v36  ;;  %v2886_v35 = vadd.f32 %v2834_v53, %v2244_v22  ;;  %v2949_v23 = vld [vmem:[#allocation2 + $0x70] sm:$0xff] (!%p3439_p4)  ;;  %v3471_v19 = vpack.c.bf16 (!%p3439_p4), %v2948_v33, %v2947_v13  ;;  %3068 = vst [vmem:[#allocation11 + $0x28] sm:$0xff] (!%p3439_p4), %v3470_v46 }
 0x3fb   : > { %2917 = vst [vmem:[#allocation2 + $0x90] sm:$0xff] %v2885_v7  ;;  %v2950_v22 = vld [vmem:[#allocation2 + $0x78] sm:$0xff] (!%p3439_p4) }
 0x3fc   : > { %2918 = vst [vmem:[#allocation2 + $0x98] sm:$0xff] %v2886_v35  ;;  %v3472_v7 = vpack.c.bf16 (!%p3439_p4), %v2950_v22, %v2949_v23  ;;  %3069 = vst [vmem:[#allocation11 + $0x30] sm:$0xff] (!%p3439_p4), %v3471_v19 }
 0x3fe   : > { %v2838_v4 = vpop.f32.mrb[52].mxu0  ;;  %3070 = vst [vmem:[#allocation11 + $0x38] sm:$0xff] (!%p3439_p4), %v3472_v7 }
 0x3ff   : > { %v2887_v55 = vadd.f32 %v2838_v4, %v2245_v39  ;;  %v2840_v54 = vpop.f32.mrb[53].mxu0 }
 0x400   : > { %v2888_v40 = vadd.f32 %v2840_v54, %v2246_v10  ;;  %v2842_v6 = vpop.f32.mrb[54].mxu0  ;;  %v2951_v36 = vld [vmem:[#allocation2 + $0x80] sm:$0xff] (!%p3439_p4) }
 0x401   : > { %2919 = vst [vmem:[#allocation2 + $0xa0] sm:$0xff] %v2887_v55  ;;  %v2889_v37 = vadd.f32 %v2842_v6, %v2247_v43  ;;  %v2844_v30 = vpop.f32.mrb[55].mxu0  ;;  %v2952_v16 = vld [vmem:[#allocation2 + $0x88] sm:$0xff] (!%p3439_p4) }
 0x402   : > { %2920 = vst [vmem:[#allocation2 + $0xa8] sm:$0xff] %v2888_v40  ;;  %v2890_v25 = vadd.f32 %v2844_v30, %v2248_v62  ;;  %v3473_v53 = vpack.c.bf16 (!%p3439_p4), %v2952_v16, %v2951_v36  ;;  %v2953_v35 = vld [vmem:[#allocation2 + $0x90] sm:$0xff] (!%p3439_p4) }
 0x403   : > { %2921 = vst [vmem:[#allocation2 + $0xb0] sm:$0xff] %v2889_v37  ;;  %v2954_v39 = vld [vmem:[#allocation2 + $0x98] sm:$0xff] (!%p3439_p4) }
 0x404   : > { %2922 = vst [vmem:[#allocation2 + $0xb8] sm:$0xff] %v2890_v25  ;;  %v3474_v4 = vpack.c.bf16 (!%p3439_p4), %v2954_v39, %v2953_v35  ;;  %3071 = vst [vmem:[#allocation11 + $0x40] sm:$0xff] (!%p3439_p4), %v3473_v53 }
 0x406   : > { %v2848_v9 = vpop.f32.mrb[56].mxu0  ;;  %3072 = vst [vmem:[#allocation11 + $0x48] sm:$0xff] (!%p3439_p4), %v3474_v4 }
 0x407   : > { %v2891_v38 = vadd.f32 %v2848_v9, %v2249_v27  ;;  %v2850_v18 = vpop.f32.mrb[57].mxu0 }
 0x408   : > { %v2892_v59 = vadd.f32 %v2850_v18, %v2250_v12  ;;  %v2852_v60 = vpop.f32.mrb[58].mxu0  ;;  %v2955_v10 = vld [vmem:[#allocation2 + $0xa0] sm:$0xff] (!%p3439_p4) }
 0x409   : > { %2923 = vst [vmem:[#allocation2 + $0xc0] sm:$0xff] %v2891_v38  ;;  %v2893_v32 = vadd.f32 %v2852_v60, %v2251_v5  ;;  %v2854_v15 = vpop.f32.mrb[59].mxu0  ;;  %v2956_v43 = vld [vmem:[#allocation2 + $0xa8] sm:$0xff] (!%p3439_p4) }
 0x40a   : > { %2924 = vst [vmem:[#allocation2 + $0xc8] sm:$0xff] %v2892_v59  ;;  %v2894_v0 = vadd.f32 %v2854_v15, %v2252_v29  ;;  %v2957_v55 = vld [vmem:[#allocation2 + $0xb0] sm:$0xff] (!%p3439_p4)  ;;  %v3475_v62 = vpack.c.bf16 (!%p3439_p4), %v2956_v43, %v2955_v10 }
 0x40b   : > { %2925 = vst [vmem:[#allocation2 + $0xd0] sm:$0xff] %v2893_v32  ;;  %v2958_v54 = vld [vmem:[#allocation2 + $0xb8] sm:$0xff] (!%p3439_p4) }
 0x40c   : > { %2926 = vst [vmem:[#allocation2 + $0xd8] sm:$0xff] %v2894_v0  ;;  %v3476_v40 = vpack.c.bf16 (!%p3439_p4), %v2958_v54, %v2957_v55  ;;  %3073 = vst [vmem:[#allocation11 + $0x50] sm:$0xff] (!%p3439_p4), %v3475_v62 }
 0x40e   : > { %v2858_v42 = vpop.f32.mrb[60].mxu0  ;;  %2934 = sbr.rel (%p3439_p4) target bundleno = 1055 (0x41f), region = 60  ;;  %3074 = vst [vmem:[#allocation11 + $0x58] sm:$0xff] (!%p3439_p4), %v3476_v40 }
 0x40f   : > { %v2895_v3 = vadd.f32 %v2858_v42, %v2253_v34  ;;  %v2860_v31 = vpop.f32.mrb[61].mxu0 }
 0x410   : > { %v2896_v41 = vadd.f32 %v2860_v31, %v2254_v61  ;;  %v2862_v14 = vpop.f32.mrb[62].mxu0  ;;  %v2959_v6 = vld [vmem:[#allocation2 + $0xc0] sm:$0xff] (!%p3439_p4) }
 0x411   : > { %2927 = vst [vmem:[#allocation2 + $0xe0] sm:$0xff] %v2895_v3  ;;  %v2897_v56 = vadd.f32 %v2862_v14, %v2255_v21  ;;  %v2864_v52 = vpop.f32.mrb[63].mxu0  ;;  %v2960_v37 = vld [vmem:[#allocation2 + $0xc8] sm:$0xff] (!%p3439_p4) }
 0x412   : > { %2928 = vst [vmem:[#allocation2 + $0xe8] sm:$0xff] %v2896_v41  ;;  %v2898_v50 = vadd.f32 %v2864_v52, %v2256_v51  ;;  %v2961_v30 = vld [vmem:[#allocation2 + $0xd0] sm:$0xff] (!%p3439_p4)  ;;  %v3477_v25 = vpack.c.bf16 (!%p3439_p4), %v2960_v37, %v2959_v6 }
 0x413   : > { %2929 = vst [vmem:[#allocation2 + $0xf0] sm:$0xff] %v2897_v56  ;;  %v2962_v27 = vld [vmem:[#allocation2 + $0xd8] sm:$0xff] (!%p3439_p4) }
 0x414   : > { %2930 = vst [vmem:[#allocation2 + $0xf8] sm:$0xff] %v2898_v50  ;;  %v3478_v5 = vpack.c.bf16 (!%p3439_p4), %v2962_v27, %v2961_v30  ;;  %3075 = vst [vmem:[#allocation11 + $0x60] sm:$0xff] (!%p3439_p4), %v3477_v25 }
 0x416   : > { %3076 = vst [vmem:[#allocation11 + $0x68] sm:$0xff] %v3478_v5 }
 0x418   : > { %v2963_v12 = vld [vmem:[#allocation2 + $0xe0] sm:$0xff] }
 0x419   : > { %v2964_v9 = vld [vmem:[#allocation2 + $0xe8] sm:$0xff] }
 0x41a   : > { %v3479_v38 = vpack.c.bf16 %v2964_v9, %v2963_v12  ;;  %v2965_v18 = vld [vmem:[#allocation2 + $0xf0] sm:$0xff] }
 0x41b   : > { %v2966_v29 = vld [vmem:[#allocation2 + $0xf8] sm:$0xff] }
 0x41c   : > { %v3480_v59 = vpack.c.bf16 %v2966_v29, %v2965_v18  ;;  %3077 = vst [vmem:[#allocation11 + $0x70] sm:$0xff] %v3479_v38 }
 0x41e   : > { %3078 = vst [vmem:[#allocation11 + $0x78] sm:$0xff] %v3480_v59 }
 0x41f PF: > { %p3544_p7 = scmp.eq.s32.totalorder %s4536_s24, 1  ;;  %s4401_s18 = smov [#allocation11]  }
 0x420   : > { %s3089_s30 = sshll.u32 %s4401_s18, 4  ;;  %s3090_s30 = int_to_ptr.vmem [resolvable:$true] %s3089_s30 }
 0x421   : > { %s4301_s10 = scalar_lea.vmem %s3090_s30, 2048  ;;  %p4308_p6 = scmp.lt.s32.totalorder %s3090_s30, %s3090_s30 }
 0x422   : > { %p4302_p9 = scmp.ne.s32.totalorder %s3090_s30, %s4301_s10  ;;  %p4309_p13 = scmp.lt.s32.totalorder %s4301_s10, %s4301_s10 }
 0x424   : > { %p4303_p12 = pnand %p4302_p9, %p3544_p7  ;;  %p4310_p3 = por %p4309_p13, %p4308_p6 }
 0x426   : > { %p4304_p10 = pneg %p4303_p12 }
 0x428   : > { %p4311_p2 = pnand %p4310_p3, %p4304_p10 }
 0x42a   : > { %4314 = shalt.err (!%p4311_p2)
}
 0x42b   : > { %s4315_s12 = scalar_lea.hbm %s5357_s4, 2048 }
 0x42c   : > { %p4316_p8 = scmp.ne.s32.totalorder %s5357_s4, %s4315_s12  ;;  %p4321_p0 = scmp.lt.u32.totalorder %s4315_s12, %s5357_s4 }
 0x42e   : > { %p4317_p5 = pnand %p4316_p8, %p3544_p7 }
 0x430   : > { %p4318_p11 = pneg %p4317_p5 }
 0x432   : > { %p4323_p1 = pnand %p4321_p0, %p4318_p11 }
 0x434   : > { %4326 = shalt.err (!%p4323_p1)
}
 0x435   : > { %s4402_s29 = smov 128   ;;  %s4403_s25 = smov 8  }
 0x436   : > { %3524 = dma.vmem_to_hbm [thread:$0]  (%p3544_p7), %s3090_s30, 2048, %s5357_s4, [#allocation5], %s4402_s29, %s4402_s29, %s4403_s25  }
 0x437   : > { %4364 = dma.done.wait (%p3544_p7), [#allocation5], 2048  }
 0x438   : > { %4366 = vsyncadd (%p3544_p7), [#allocation5], 4294965248 }
 0x439 PF: > { %s22_s20 = sadd.s32 1, %s4389_s20   ;;  %s5387_s15 = smov %s4373_s16 }
 0x43a   : > { %p19_p4 = scmp.ge.s32.totalorder %s22_s20, 4   ;;  %s5388_s16 = smov %s4377_s17 }
 0x43b   : > { %s5389_s17 = smov %s4476_s27  ;;  %s5390_s18 = smov %s4385_s19 }
 0x43c   : > { %s5391_s19 = smov %s5393_s21  ;;  %21 = sbr.rel (!%p19_p4) target bundleno = 11 (0xb), region = 112 }
 0x443   :  { %3105 = vsyncpa [#allocation4], 1 }
 0x444   :  { %3107 = vsyncpa [#allocation4 + $0x1], 1 }
 0x445   :  { %3108 = vsyncpa [#allocation7], 1 }
 0x446   :  { %3110 = vsyncpa [#allocation7 + $0x1], 1 }
 0x447   :  { %3111 = vsyncpa [#allocation10], 1 }
 0x448   :  { %3113 = vsyncpa [#allocation10 + $0x1], 1 }
 0x449   :  { %3114 = vsyncpa [#allocation5], 1 }
 0x44a   :  { %3116 = vsyncpa [#allocation5 + $0x1], 1 }

</bundles_post_ra>
